<compile_context>
chip_gen: v5e
topology: v5e:2x2
jax: 0.10.0
libtpu: 0.0.40
codegen_flags: <defaults>
</compile_context>

<pallas_src>
import jax
import jax.numpy as jnp
from jax.experimental import pallas as pl
from jax.experimental.pallas import tpu as pltpu

LANE = 128  # padded output width (lane-dense stores)


def mlp_kernel(x_ref,
               w1_ref, b1_ref,
               w2_ref, b2_ref,
               w3_ref, b3_ref,
               w4_ref, b4_ref,
               o_ref):
    # ---- Layer 1: (TM,2) x (2,H) on the VPU (two broadcast FMAs), f32 ----
    x = x_ref[...]                                    # (TM, 2)  f32
    w1 = w1_ref[...]                                  # (2, H)   f32
    h = x[:, 0:1] * w1[0:1, :] + x[:, 1:2] * w1[1:2, :] + b1_ref[...]
    h = jnp.maximum(h, 0.0)

    # ---- Layer 2: (TM,H) @ (H,H) on MXU, bf16 inputs, f32 accumulate ----
    h = jnp.dot(h.astype(jnp.bfloat16), w2_ref[...],
                preferred_element_type=jnp.float32)
    h = jnp.maximum(h + b2_ref[...], 0.0)

    # ---- Layer 3: (TM,H) @ (H,H) ----
    h = jnp.dot(h.astype(jnp.bfloat16), w3_ref[...],
                preferred_element_type=jnp.float32)
    h = jnp.maximum(h + b3_ref[...], 0.0)

    # ---- Layer 4: (TM,H) @ (H,128)  (output padded to lane width 128) ----
    h = jnp.dot(h.astype(jnp.bfloat16), w4_ref[...],
                preferred_element_type=jnp.float32)
    o_ref[...] = jnp.maximum(h + b4_ref[...], 0.0).astype(o_ref.dtype)


def mlp_forward(x, params, *, tm=256):
    """x: (N, 2) float32; params: list of 4 (W_in_out, b_row) tuples (f32)."""
    n, in_dim = x.shape
    assert in_dim == 2
    (w1, b1), (w2, b2), (w3, b3), (w4, b4) = params
    hdim = w1.shape[1]
    out_dim = w4.shape[1]
    assert hdim % LANE == 0, "hidden width must be a multiple of 128"

    # Pad batch to a multiple of the tile; pad the final layer to 128 lanes.
    n_pad = tm * pl.cdiv(n, tm)
    x_p = jnp.pad(x, ((0, n_pad - n), (0, 0)))
    w4_p = jnp.pad(w4, ((0, 0), (0, LANE - out_dim)))
    b4_p = jnp.pad(b4, ((0, 0), (0, LANE - out_dim)))

    # bf16 weights for the MXU layers (accumulation stays f32 in-kernel).
    w2b = w2.astype(jnp.bfloat16)
    w3b = w3.astype(jnp.bfloat16)
    w4b = w4_p.astype(jnp.bfloat16)

    const = lambda i: (0, 0)  # weights/biases: same block every grid step

    flops = 2 * n_pad * (2 * hdim + hdim * hdim + hdim * hdim + hdim * LANE)
    bytes_accessed = (x_p.size * 4 + n_pad * LANE * 4
                      + w1.size * 4 + (w2b.size + w3b.size + w4b.size) * 2
                      + (b1.size + b2.size + b3.size + b4_p.size) * 4)

    out = pl.pallas_call(
        mlp_kernel,
        out_shape=jax.ShapeDtypeStruct((n_pad, LANE), jnp.float32),
        grid_spec=pltpu.PrefetchScalarGridSpec(
            num_scalar_prefetch=0,
            grid=(n_pad // tm,),
            in_specs=[
                pl.BlockSpec((tm, 2), lambda i: (i, 0)),     # x tile
                pl.BlockSpec((2, hdim), const),              # w1
                pl.BlockSpec((1, hdim), const),              # b1
                pl.BlockSpec((hdim, hdim), const),           # w2 (bf16)
                pl.BlockSpec((1, hdim), const),              # b2
                pl.BlockSpec((hdim, hdim), const),           # w3 (bf16)
                pl.BlockSpec((1, hdim), const),              # b3
                pl.BlockSpec((hdim, LANE), const),           # w4 padded (bf16)
                pl.BlockSpec((1, LANE), const),              # b4 padded
            ],
            out_specs=pl.BlockSpec((tm, LANE), lambda i: (i, 0)),
        ),
        compiler_params=pltpu.CompilerParams(
            dimension_semantics=("parallel",)),
        cost_estimate=pl.CostEstimate(flops=flops,
                                      bytes_accessed=bytes_accessed,
                                      transcendentals=0),
    )(x_p, w1, b1, w2b, b2, w3b, b3, w4b, b4_p)

    return out[:n, :out_dim]


def init_params(key, n_layers=4, n_hidden_units=256):
    """Deterministic init matching the shapes of the PyTorch MLP.__init__.

    Weights stored as (in_features, out_features) (transposed vs PyTorch),
    biases as (1, out_features) rows.
    """
    dims = [2] + [n_hidden_units] * (n_layers - 1) + [3]
    params = []
    for i in range(n_layers):
        fan_in, fan_out = dims[i], dims[i + 1]
        key, kw, kb = jax.random.split(key, 3)
        bound = 1.0 / (fan_in ** 0.5)  # PyTorch Linear default uniform bound
        w = jax.random.uniform(kw, (fan_in, fan_out), jnp.float32, -bound, bound)
        b = jax.random.uniform(kb, (1, fan_out), jnp.float32, -bound, bound)
        params.append((w, b))
    return params


def mlp_reference(x, params):
    """Reference mirroring the kernel numerics (f32 layer 1, bf16 MXU inputs)."""
    (w1, b1), *rest = params
    h = jnp.maximum(jnp.dot(x, w1) + b1, 0.0)
    for w, b in rest:
        acc = jnp.dot(h.astype(jnp.bfloat16), w.astype(jnp.bfloat16),
                      preferred_element_type=jnp.float32)
        h = jnp.maximum(acc + b, 0.0)
    return h


if __name__ == "__main__":
    key = jax.random.PRNGKey(0)
    key, kx = jax.random.split(key)

    n_batch = 300            # not a multiple of TM -> exercises padding + 2 tiles
    x = jax.random.normal(kx, (n_batch, 2), jnp.float32)

    params = init_params(key, n_layers=4, n_hidden_units=256)

    out = mlp_forward(x, params, tm=256)
    out = jax.block_until_ready(out)

    ref = mlp_reference(x, params)
    assert out.shape == (n_batch, 3), out.shape
    assert jnp.allclose(out, ref, atol=2e-3, rtol=2e-2), \
        f"mismatch vs reference: max abs err {jnp.max(jnp.abs(out - ref))}"

    print("KERNEL_OK")
</pallas_src>

<mosaic_0001>
module attributes {stable_mosaic.version = 11 : i64} {
  func.func @mlp_kernel(%arg0: i32, %arg1: memref<256x2xf32, #tpu.memory_space<vmem>>, %arg2: memref<2x256xf32, #tpu.memory_space<vmem>>, %arg3: memref<1x256xf32, #tpu.memory_space<vmem>>, %arg4: memref<256x256xbf16, #tpu.memory_space<vmem>>, %arg5: memref<1x256xf32, #tpu.memory_space<vmem>>, %arg6: memref<256x256xbf16, #tpu.memory_space<vmem>>, %arg7: memref<1x256xf32, #tpu.memory_space<vmem>>, %arg8: memref<256x128xbf16, #tpu.memory_space<vmem>>, %arg9: memref<1x128xf32, #tpu.memory_space<vmem>>, %arg10: memref<256x128xf32, #tpu.memory_space<vmem>>) attributes {dimension_semantics = [#tpu.dimension_semantics<parallel>], iteration_bounds = array<i64: 2>, scalar_prefetch = 0 : i64, scratch_operands = 0 : i64, tpu.core_type = #tpu.core_type<tc>, window_params = [{transform_indices = @transform_0, window_bounds = array<i64: 256, 2>}, {pipeline_mode = #tpu.pipeline_mode<synchronous>, transform_indices = @transform_1, window_bounds = array<i64: 2, 256>}, {pipeline_mode = #tpu.pipeline_mode<synchronous>, transform_indices = @transform_2, window_bounds = array<i64: 1, 256>}, {pipeline_mode = #tpu.pipeline_mode<synchronous>, transform_indices = @transform_3, window_bounds = array<i64: 256, 256>}, {pipeline_mode = #tpu.pipeline_mode<synchronous>, transform_indices = @transform_4, window_bounds = array<i64: 1, 256>}, {pipeline_mode = #tpu.pipeline_mode<synchronous>, transform_indices = @transform_5, window_bounds = array<i64: 256, 256>}, {pipeline_mode = #tpu.pipeline_mode<synchronous>, transform_indices = @transform_6, window_bounds = array<i64: 1, 256>}, {pipeline_mode = #tpu.pipeline_mode<synchronous>, transform_indices = @transform_7, window_bounds = array<i64: 256, 128>}, {pipeline_mode = #tpu.pipeline_mode<synchronous>, transform_indices = @transform_8, window_bounds = array<i64: 1, 128>}, {transform_indices = @transform_9, window_bounds = array<i64: 256, 128>}]} {
    %c0 = arith.constant 0 : index
    %c0_0 = arith.constant 0 : index
    %0 = vector.load %arg1[%c0, %c0_0] : memref<256x2xf32, #tpu.memory_space<vmem>>, vector<256x2xf32>
    %c0_1 = arith.constant 0 : index
    %c0_2 = arith.constant 0 : index
    %1 = vector.load %arg2[%c0_1, %c0_2] : memref<2x256xf32, #tpu.memory_space<vmem>>, vector<2x256xf32>
    %2 = vector.extract_strided_slice %0 {offsets = [0, 0], sizes = [256, 1], strides = [1, 1]} : vector<256x2xf32> to vector<256x1xf32>
    %3 = vector.extract_strided_slice %1 {offsets = [0, 0], sizes = [1, 256], strides = [1, 1]} : vector<2x256xf32> to vector<1x256xf32>
    %4 = vector.broadcast %2 : vector<256x1xf32> to vector<256x256xf32>
    %5 = vector.broadcast %3 : vector<1x256xf32> to vector<256x256xf32>
    %6 = arith.mulf %4, %5 : vector<256x256xf32>
    %7 = vector.extract_strided_slice %0 {offsets = [0, 1], sizes = [256, 1], strides = [1, 1]} : vector<256x2xf32> to vector<256x1xf32>
    %8 = vector.extract_strided_slice %1 {offsets = [1, 0], sizes = [1, 256], strides = [1, 1]} : vector<2x256xf32> to vector<1x256xf32>
    %9 = vector.broadcast %7 : vector<256x1xf32> to vector<256x256xf32>
    %10 = vector.broadcast %8 : vector<1x256xf32> to vector<256x256xf32>
    %11 = arith.mulf %9, %10 : vector<256x256xf32>
    %12 = arith.addf %6, %11 : vector<256x256xf32>
    %c0_3 = arith.constant 0 : index
    %c0_4 = arith.constant 0 : index
    %13 = vector.load %arg3[%c0_3, %c0_4] : memref<1x256xf32, #tpu.memory_space<vmem>>, vector<1x256xf32>
    %14 = vector.broadcast %13 : vector<1x256xf32> to vector<256x256xf32>
    %15 = arith.addf %12, %14 : vector<256x256xf32>
    %cst = arith.constant 0.000000e+00 : f32
    %16 = vector.broadcast %cst : f32 to vector<256x256xf32>
    %17 = arith.maximumf %15, %16 : vector<256x256xf32>
    %18 = arith.truncf %17 : vector<256x256xf32> to vector<256x256xbf16>
    %c0_5 = arith.constant 0 : index
    %c0_6 = arith.constant 0 : index
    %19 = vector.load %arg4[%c0_5, %c0_6] : memref<256x256xbf16, #tpu.memory_space<vmem>>, vector<256x256xbf16>
    %cst_7 = arith.constant dense<0.000000e+00> : vector<256x256xf32>
    %20 = tpu.matmul %18, %19, %cst_7 {dimension_numbers = #tpu.dot_dimension_numbers<[1], [0], [0], [1], [0, 0, 1, 1], [], []>} : vector<256x256xbf16>, vector<256x256xbf16>, vector<256x256xf32> -> vector<256x256xf32>
    %c0_8 = arith.constant 0 : index
    %c0_9 = arith.constant 0 : index
    %21 = vector.load %arg5[%c0_8, %c0_9] : memref<1x256xf32, #tpu.memory_space<vmem>>, vector<1x256xf32>
    %22 = vector.broadcast %21 : vector<1x256xf32> to vector<256x256xf32>
    %23 = arith.addf %20, %22 : vector<256x256xf32>
    %cst_10 = arith.constant 0.000000e+00 : f32
    %24 = vector.broadcast %cst_10 : f32 to vector<256x256xf32>
    %25 = arith.maximumf %23, %24 : vector<256x256xf32>
    %26 = arith.truncf %25 : vector<256x256xf32> to vector<256x256xbf16>
    %c0_11 = arith.constant 0 : index
    %c0_12 = arith.constant 0 : index
    %27 = vector.load %arg6[%c0_11, %c0_12] : memref<256x256xbf16, #tpu.memory_space<vmem>>, vector<256x256xbf16>
    %cst_13 = arith.constant dense<0.000000e+00> : vector<256x256xf32>
    %28 = tpu.matmul %26, %27, %cst_13 {dimension_numbers = #tpu.dot_dimension_numbers<[1], [0], [0], [1], [0, 0, 1, 1], [], []>} : vector<256x256xbf16>, vector<256x256xbf16>, vector<256x256xf32> -> vector<256x256xf32>
    %c0_14 = arith.constant 0 : index
    %c0_15 = arith.constant 0 : index
    %29 = vector.load %arg7[%c0_14, %c0_15] : memref<1x256xf32, #tpu.memory_space<vmem>>, vector<1x256xf32>
    %30 = vector.broadcast %29 : vector<1x256xf32> to vector<256x256xf32>
    %31 = arith.addf %28, %30 : vector<256x256xf32>
    %cst_16 = arith.constant 0.000000e+00 : f32
    %32 = vector.broadcast %cst_16 : f32 to vector<256x256xf32>
    %33 = arith.maximumf %31, %32 : vector<256x256xf32>
    %34 = arith.truncf %33 : vector<256x256xf32> to vector<256x256xbf16>
    %c0_17 = arith.constant 0 : index
    %c0_18 = arith.constant 0 : index
    %35 = vector.load %arg8[%c0_17, %c0_18] : memref<256x128xbf16, #tpu.memory_space<vmem>>, vector<256x128xbf16>
    %cst_19 = arith.constant dense<0.000000e+00> : vector<256x128xf32>
    %36 = tpu.matmul %34, %35, %cst_19 {dimension_numbers = #tpu.dot_dimension_numbers<[1], [0], [0], [1], [0, 0, 1, 1], [], []>} : vector<256x256xbf16>, vector<256x128xbf16>, vector<256x128xf32> -> vector<256x128xf32>
    %c0_20 = arith.constant 0 : index
    %c0_21 = arith.constant 0 : index
    %37 = vector.load %arg9[%c0_20, %c0_21] : memref<1x128xf32, #tpu.memory_space<vmem>>, vector<1x128xf32>
    %38 = vector.broadcast %37 : vector<1x128xf32> to vector<256x128xf32>
    %39 = arith.addf %36, %38 : vector<256x128xf32>
    %cst_22 = arith.constant 0.000000e+00 : f32
    %40 = vector.broadcast %cst_22 : f32 to vector<256x128xf32>
    %41 = arith.maximumf %39, %40 : vector<256x128xf32>
    %c0_23 = arith.constant 0 : index
    %c0_24 = arith.constant 0 : index
    %42 = vector.load %arg10[%c0_23, %c0_24] : memref<256x128xf32, #tpu.memory_space<vmem>>, vector<256x128xf32>
    tpu.vector_store %arg10[%c0_23, %c0_24], %41 {strides = array<i32>} : memref<256x128xf32, #tpu.memory_space<vmem>>, vector<256x128xf32>,
    return
  }
  func.func @transform_0(%arg0: i32) -> (i32, i32) {
    %c0_i32 = arith.constant 0 : i32
    %c0_i32_0 = arith.constant 0 : i32
    return %arg0, %c0_i32 : i32, i32
  }
  func.func @transform_1(%arg0: i32) -> (i32, i32) {
    %c0_i32 = arith.constant 0 : i32
    %c0_i32_0 = arith.constant 0 : i32
    %c0_i32_1 = arith.constant 0 : i32
    return %c0_i32, %c0_i32_0 : i32, i32
  }
  func.func @transform_2(%arg0: i32) -> (i32, i32) {
    %c0_i32 = arith.constant 0 : i32
    %c0_i32_0 = arith.constant 0 : i32
    %c0_i32_1 = arith.constant 0 : i32
    return %c0_i32, %c0_i32_0 : i32, i32
  }
  func.func @transform_3(%arg0: i32) -> (i32, i32) {
    %c0_i32 = arith.constant 0 : i32
    %c0_i32_0 = arith.constant 0 : i32
    %c0_i32_1 = arith.constant 0 : i32
    return %c0_i32, %c0_i32_0 : i32, i32
  }
  func.func @transform_4(%arg0: i32) -> (i32, i32) {
    %c0_i32 = arith.constant 0 : i32
    %c0_i32_0 = arith.constant 0 : i32
    %c0_i32_1 = arith.constant 0 : i32
    return %c0_i32, %c0_i32_0 : i32, i32
  }
  func.func @transform_5(%arg0: i32) -> (i32, i32) {
    %c0_i32 = arith.constant 0 : i32
    %c0_i32_0 = arith.constant 0 : i32
    %c0_i32_1 = arith.constant 0 : i32
    return %c0_i32, %c0_i32_0 : i32, i32
  }
  func.func @transform_6(%arg0: i32) -> (i32, i32) {
    %c0_i32 = arith.constant 0 : i32
    %c0_i32_0 = arith.constant 0 : i32
    %c0_i32_1 = arith.constant 0 : i32
    return %c0_i32, %c0_i32_0 : i32, i32
  }
  func.func @transform_7(%arg0: i32) -> (i32, i32) {
    %c0_i32 = arith.constant 0 : i32
    %c0_i32_0 = arith.constant 0 : i32
    %c0_i32_1 = arith.constant 0 : i32
    return %c0_i32, %c0_i32_0 : i32, i32
  }
  func.func @transform_8(%arg0: i32) -> (i32, i32) {
    %c0_i32 = arith.constant 0 : i32
    %c0_i32_0 = arith.constant 0 : i32
    %c0_i32_1 = arith.constant 0 : i32
    return %c0_i32, %c0_i32_0 : i32, i32
  }
  func.func @transform_9(%arg0: i32) -> (i32, i32) {
    %c0_i32 = arith.constant 0 : i32
    %c0_i32_0 = arith.constant 0 : i32
    return %arg0, %c0_i32 : i32, i32
  }
}

</mosaic_0001>

<bundles_post_ra>
// kernel: tpu_custom_call.1
= control target key start
LH: loop header
LB: loop body
LE: loop exit
PB: predicated region body
PF: predicated region fallthrough
CT: control target
= control target key end

     0   :  { %14 = vsyncpa [#allocation3], 0  ;;  %s4872_s0 = inlined_call_operand.vmem [shape: f32[512,2], index: 0, kind: input, shape index: {}]   ;;  %s4873_s1 = inlined_call_operand.vmem [shape: f32[2,256], index: 1, kind: input, shape index: {}]   ;;  %s4874_s2 = inlined_call_operand.vmem [shape: f32[1,256], index: 2, kind: input, shape index: {}]   ;;  %s4875_s3 = inlined_call_operand.vmem [shape: bf16[256,256], index: 3, kind: input, shape index: {}]   ;;  %s4876_s4 = inlined_call_operand.vmem [shape: f32[1,256], index: 4, kind: input, shape index: {}]   ;;  %s4877_s5 = inlined_call_operand.vmem [shape: bf16[256,256], index: 5, kind: input, shape index: {}]   ;;  %s4878_s6 = inlined_call_operand.vmem [shape: f32[1,256], index: 6, kind: input, shape index: {}]   ;;  %s4879_s7 = inlined_call_operand.hbm [shape: bf16[256,128], index: 7, kind: input, shape index: {}]   ;;  %s4880_s8 = inlined_call_operand.vmem [shape: f32[1,128], index: 8, kind: input, shape index: {}]   ;;  %s4881_s9 = inlined_call_operand.hbm [shape: f32[512,128], index: 9, kind: output, shape index: {}]  }
   0x1   :  { %15 = vsyncpa [#allocation4], 0 }
   0x2   :  { %17 = vsyncpa [#allocation4 + $0x1], 0  ;;  %s3488_s30 = smov 0   ;;  %s3490_s10 = smov 0  }
   0x3   :  { %s3492_s11 = smov 0   ;;  %s3494_s12 = smov 0  }
   0x4 LB: > { %s3509_s13 = sadd.s32 4294967295, %s3429_s12   ;;  %s2807_s14 = sadd.s32 4294967294, %s3429_s12   ;;  %s3429_s12 = sphi %s3494_s12, %s4887_s12   ;;  %s3425_s11 = sphi %s3492_s11, %s4886_s11   ;;  %s3421_s10 = sphi %s3490_s10, %s4885_s10   ;;  %s3417_s30 = sphi %s3488_s30, %s4884_s30  }
   0x5   : > { %s3513_s15 = sadd.s32 1, %s3429_s12   ;;  %s224_s16 = sadd.s32 1, %s3425_s11 }
   0x6   : > { %s221_s17 = ssub.s32 %s3429_s12, %s3513_s15  ;;  %p234_p0 = scmp.ne.s32.totalorder %s3425_s11, %s3421_s10 }
   0x7   : > { %p222_p1 = scmp.eq.s32.totalorder %s221_s17, 0  ;;  %p235_p2 = scmp.eq.s32.totalorder %s3509_s13, 1 }
   0x8   : > { %p240_p3 = scmp.ne.s32.totalorder %s3421_s10, %s3417_s30  ;;  %p241_p4 = scmp.eq.s32.totalorder %s2807_s14, 1 }
   0x9   : > { %s3524_s18 = scalar_select %p222_p1, %s3425_s11, %s224_s16  }
   0xa   : > { %p3526_p5 = por %p235_p2, %p234_p0  ;;  %p3530_p6 = por %p241_p4, %p240_p3 }
   0xb   : > { %p2808_p7 = scmp.ge.s32.totalorder %s3429_s12, 1  ;;  %p248_p8 = scmp.lt.s32.totalorder %s3429_s12, 3 }
   0xc   : > { %p3252_p9 = scmp.eq.s32.totalorder %s3509_s13, 0  ;;  %s277_s23 = sshll.u32 %s4879_s7, 4  ;;  %s278_s23 = int_to_ptr.hbm [resolvable:$true] %s277_s23 }
   0xd   : > { %p249_p10 = pnand %p2808_p7, %p248_p8  ;;  %s3431_s24 = smov [#allocation2]  }
   0xe   : > { %s279_s25 = sshll.u32 %s3431_s24, 4  ;;  %s3432_s26 = smov 64   ;;  %s280_s25 = int_to_ptr.vmem [resolvable:$true] %s279_s25 }
   0xf   : > { %p3244_p11 = pneg %p249_p10  ;;  %s3433_s27 = smov 4  }
  0x10   : > { %307 = sbr.rel (%p249_p10) target bundleno = 1076 (0x434), region = 56 }
  0x11   : > { %p3245_p12 = pnand %p3252_p9, %p3244_p11 }
  0x13   : > { %3247 = dma.hbm_to_vmem [thread:$0]  (!%p3245_p12), %s278_s23, 2048, %s280_s25, [#allocation3], %s3432_s26, %s3432_s26, %s3433_s27  }
  0x15   : > { %3408 = dma.done.wait (%p3252_p9), [#allocation3], 2048  }
  0x16   : > { %3410 = vsyncadd (%p3252_p9), [#allocation3], 4294965248  ;;  %s2814_s28 = sshll.u32 %s3509_s13, 5  ;;  %v3434_v0 = vmov 1   ;;  %v3435_v1 = vmov 0   ;;  %s3221_s24 = sshll.u32 %s3509_s13, 8 }
  0x17   : > { %3295 = vset.pattern.permute.xlu1 %v3434_v0  ;;  %3294 = vset.pattern.permute.xlu0 %v3435_v1  ;;  %p345_p13 = scmp.lt.s32.totalorder %s2814_s28, 63  ;;  %v2874_v15 = vld [vmem:[%s4875_s3 + $0x70] sm:$0xf]  ;;  %v3156_v16 = vld [vmem:[%s4875_s3 + $0x74] sm:$0xf0]  ;;  %s2729_s27 = scalar_lea.hbm %s4881_s9, %s3221_s24 }
  0x18   : > { %3296 = vset.pattern.permute.xlu2 %v3435_v1  ;;  %v2938_v17 = vld [vmem:[%s4875_s3 + $0xf0] sm:$0xf]  ;;  %v2875_v18 = vor.u32 %v3156_v16, %v2874_v15  ;;  %v3172_v19 = vld [vmem:[%s4875_s3 + $0xf4] sm:$0xf0]  ;;  %v2866_v23 = vld [vmem:[%s4875_s3 + $0x60] sm:$0xf] }
  0x19   : > { %s4889_s28 = smov (!%p345_p13, %s2814_s28), 63  ;;  %v2939_v20 = vor.u32 %v3172_v19, %v2938_v17  ;;  %v3154_v24 = vld [vmem:[%s4875_s3 + $0x64] sm:$0xf0]  ;;  %v2930_v26 = vld [vmem:[%s4875_s3 + $0xe0] sm:$0xf]  ;;  %s3383_s24 = scalar_lea.hbm %s4881_s9, 512 }
  0x1a   : > { %s2815_s29 = sshll.u32 %s4889_s28, 3  ;;  %3222 = vmatpush.bf16.msra.mxu2 %v2875_v18  ;;  %1241 = vmatpush.bf16.msra.mxu0 %v2875_v18  ;;  %v2867_v25 = vor.u32 %v3154_v24, %v2866_v23  ;;  %v3170_v27 = vld [vmem:[%s4875_s3 + $0xe4] sm:$0xf0]  ;;  %v2858_v29 = vld [vmem:[%s4875_s3 + $0x50] sm:$0xf] }
  0x1b   : > { %s3553_s17 = scalar_lea.vmem %s4872_s0, %s2815_s29  ;;  %3230 = vmatpush.bf16.msra.mxu3 %v2939_v20  ;;  %1330 = vmatpush.bf16.msra.mxu1 %v2939_v20  ;;  %v2931_v28 = vor.u32 %v3170_v27, %v2930_v26  ;;  %v3152_v30 = vld [vmem:[%s4875_s3 + $0x54] sm:$0xf0]  ;;  %v2922_v31 = vld [vmem:[%s4875_s3 + $0xd0] sm:$0xf]  ;;  %v2850_v36 = vld [vmem:[%s4875_s3 + $0x40] sm:$0xf] }
  0x1c   : > { %v367_v2 = vld [vmem:[%s3553_s17 + $0x80] sm:$0xff]  ;;  %v369_v3 = vld [vmem:[%s3553_s17 + $0x90] sm:$0xff]  ;;  %v368_v4 = vld [vmem:[%s3553_s17 + $0x88] sm:$0xff]  ;;  %v2859_v33 = vor.u32 %v3152_v30, %v2858_v29  ;;  %s2732_s29 = sshll.u32 %s2729_s27, 4  ;;  %s2733_s29 = int_to_ptr.hbm [resolvable:$true] %s2732_s29 }
  0x1d   : > { %680 = vperm.xlu1 %3295, %v367_v2   ;;  %466 = vperm.xlu0 %3294, %v367_v2   ;;  %v370_v5 = vld [vmem:[%s3553_s17 + $0x98] sm:$0xff]  ;;  %v371_v6 = vld [vmem:[%s3553_s17 + $0xa0] sm:$0xff]  ;;  %v372_v7 = vld [vmem:[%s3553_s17 + $0xa8] sm:$0xff]  ;;  %s3377_s14 = sshra.s32 %s2733_s29, 4  ;;  %s3378_s14 = int_to_ptr.hbm [resolvable:$true] %s3377_s14 }
  0x1e   : > { %476 = vperm.xlu2 %3296, %v369_v3   ;;  %v373_v8 = vld [vmem:[%s3553_s17 + $0xb0] sm:$0xff]  ;;  %v374_v9 = vld [vmem:[%s3553_s17 + $0xb8] sm:$0xff]  ;;  %v376_v10 = vld [vmem:[%s3553_s17 + $0xc8] sm:$0xff]  ;;  %3223 = vmatpush.bf16.msra.mxu2 %v2867_v25  ;;  %s3379_s16 = scalar_lea.hbm %s3378_s14, 256  ;;  %p3384_p3 = scmp.lt.s32.totalorder %s3378_s14, %s4881_s9 }
  0x1f   : > { %v375_v11 = vld [vmem:[%s3553_s17 + $0xc0] sm:$0xff]  ;;  %v377_v12 = vld [vmem:[%s3553_s17 + $0xd0] sm:$0xff]  ;;  %v380_v13 = vld [vmem:[%s3553_s17 + $0xe8] sm:$0xff]  ;;  %1242 = vmatpush.bf16.msra.mxu0 %v2867_v25  ;;  %3231 = vmatpush.bf16.msra.mxu3 %v2931_v28  ;;  %p3380_p0 = scmp.ne.s32.totalorder %s3378_s14, %s3379_s16  ;;  %p3385_p4 = scmp.lt.s32.totalorder %s3383_s24, %s3379_s16 }
  0x20   : > { %v378_v14 = vld [vmem:[%s3553_s17 + $0xd8] sm:$0xff]  ;;  %v381_v21 = vld [vmem:[%s3553_s17 + $0xf0] sm:$0xff]  ;;  %v379_v22 = vld [vmem:[%s3553_s17 + $0xe0] sm:$0xff]  ;;  %1331 = vmatpush.bf16.msra.mxu1 %v2931_v28 }
  0x21   : > { %v3615_v32 = vld [vmem:[%s3553_s17 + $0x8] sm:$0xff]  ;;  %v3168_v34 = vld [vmem:[%s4875_s3 + $0xd4] sm:$0xf0]  ;;  %v2914_v38 = vld [vmem:[%s4875_s3 + $0xc0] sm:$0xf]  ;;  %p3381_p1 = pnand %p3380_p0, %p3526_p5  ;;  %p3386_p7 = por %p3385_p4, %p3384_p3 }
  0x22   : > { %v2923_v35 = vor.u32 %v3168_v34, %v2922_v31  ;;  %3224 = vmatpush.bf16.msra.mxu2 %v2859_v33  ;;  %v3150_v37 = vld [vmem:[%s4875_s3 + $0x44] sm:$0xf0]  ;;  %v2842_v42 = vld [vmem:[%s4875_s3 + $0x30] sm:$0xf]  ;;  %v3148_v43 = vld [vmem:[%s4875_s3 + $0x34] sm:$0xf0] }
  0x23   : > { %1243 = vmatpush.bf16.msra.mxu0 %v2859_v33  ;;  %v2851_v39 = vor.u32 %v3150_v37, %v2850_v36  ;;  %v3166_v40 = vld [vmem:[%s4875_s3 + $0xc4] sm:$0xf0]  ;;  %v2906_v44 = vld [vmem:[%s4875_s3 + $0xb0] sm:$0xf]  ;;  %v2843_v46 = vor.u32 %v3148_v43, %v2842_v42  ;;  %v3164_v47 = vld [vmem:[%s4875_s3 + $0xb4] sm:$0xf0]  ;;  %p3382_p2 = pneg %p3381_p1 }
  0x24   : > { %3232 = vmatpush.bf16.msra.mxu3 %v2923_v35  ;;  %1332 = vmatpush.bf16.msra.mxu1 %v2923_v35  ;;  %v2915_v41 = vor.u32 %v3166_v40, %v2914_v38  ;;  %v3646_v45 = vld [vmem:[%s3553_s17 + $0x10] sm:$0xff]  ;;  %v2907_v48 = vor.u32 %v3164_v47, %v2906_v44  ;;  %v382_v49 = vld [vmem:[%s3553_s17 + $0xf8] sm:$0xff]  ;;  %v2834_v50 = vld [vmem:[%s4875_s3 + $0x20] sm:$0xf] }
  0x25   : > { %684 = vperm.xlu1 %3295, %v368_v4   ;;  %471 = vperm.xlu0 %3294, %v368_v4   ;;  %v3146_v51 = vld [vmem:[%s4875_s3 + $0x24] sm:$0xf0]  ;;  %v2898_v53 = vld [vmem:[%s4875_s3 + $0xa0] sm:$0xf]  ;;  %v2826_v57 = vld [vmem:[%s4875_s3 + $0x10] sm:$0xf]  ;;  %p3387_p8 = pnand %p3386_p7, %p3382_p2 }
  0x26   : > { %481 = vperm.xlu2 %3296, %v370_v5   ;;  %3225 = vmatpush.bf16.msra.mxu2 %v2851_v39  ;;  %v2835_v52 = vor.u32 %v3146_v51, %v2834_v50  ;;  %v3162_v54 = vld [vmem:[%s4875_s3 + $0xa4] sm:$0xf0]  ;;  %v3144_v58 = vld [vmem:[%s4875_s3 + $0x14] sm:$0xf0]  ;;  %v2890_v59 = vld [vmem:[%s4875_s3 + $0x90] sm:$0xf] }
  0x27   : > { %1244 = vmatpush.bf16.msra.mxu0 %v2851_v39  ;;  %v2899_v55 = vor.u32 %v3162_v54, %v2898_v53  ;;  %v2827_v60 = vor.u32 %v3144_v58, %v2826_v57  ;;  %v3160_v61 = vld [vmem:[%s4875_s3 + $0x94] sm:$0xf0]  ;;  %v2818_v63 = vld [vmem:[%s4875_s3] sm:$0xf]  ;;  %v3142_v2 = vld [vmem:[%s4875_s3 + $0x4] sm:$0xf0] }
  0x28   : > { %3233 = vmatpush.bf16.msra.mxu3 %v2915_v41  ;;  %1333 = vmatpush.bf16.msra.mxu1 %v2915_v41  ;;  %v2891_v62 = vor.u32 %v3160_v61, %v2890_v59  ;;  %v2819_v4 = vor.u32 %v3142_v2, %v2818_v63  ;;  %v383_v16 = vld [vmem:[%s4873_s1] sm:$0xf]  ;;  %v354_v27 = vld [vmem:[%s3553_s17 + $0x18] sm:$0xff]  ;;  %v3153_v36 = vld [vmem:[%s4875_s3 + $0x64] sm:$0xf] }
  0x29   : > { %v545_v18 = vperm.slane %v383_v16, 0  ;;  %v546_v19 = vperm.slane %v383_v16, 2  ;;  %v743_v20 = vperm.slane %v383_v16, 1  ;;  %v877_v34 = vld [vmem:[%s4874_s2] sm:$0x3] }
  0x2a   : > { %3226 = vmatpush.bf16.msra.mxu2 %v2843_v46  ;;  %v2868_v37 = vld [vmem:[%s4875_s3 + $0x68] sm:$0xf0]  ;;  %v3169_v38 = vld [vmem:[%s4875_s3 + $0xe4] sm:$0xf] }
  0x2b   : > { %1245 = vmatpush.bf16.msra.mxu0 %v2843_v46  ;;  %v3726_v23 = vperm.slane %v545_v18, 0  ;;  %v3728_v24 = vperm.slane %v546_v19, 0  ;;  %v3730_v25 = vperm.slane %v743_v20, 1  ;;  %v2871_v39 = vor.u32 %v3153_v36, %v2868_v37  ;;  %v2932_v40 = vld [vmem:[%s4875_s3 + $0xe8] sm:$0xf0]  ;;  %v355_v41 = vld [vmem:[%s3553_s17 + $0x20] sm:$0xff] }
  0x2c   : > { %3234 = vmatpush.bf16.msra.mxu3 %v2907_v48  ;;  %1334 = vmatpush.bf16.msra.mxu1 %v2907_v48  ;;  %v2935_v42 = vor.u32 %v3169_v38, %v2932_v40  ;;  %v3762_v46 = vperm.slane %v877_v34, 1  ;;  %v3167_v19 = vld [vmem:[%s4875_s3 + $0xd4] sm:$0xf]  ;;  %v358_v38 = vld [vmem:[%s3553_s17 + $0x38] sm:$0xff] }
  0x2d   : > { %692 = vperm.xlu1 %3295, %v370_v5   ;;  %3297 = vset.pattern.permute.xlu0 %v3434_v0  ;;  %v3158_v5 = vld [vmem:[%s4875_s3 + $0x84] sm:$0xf0] }
  0x2e   : > { %688 = vperm.xlu0 %3297, %v369_v3   ;;  %486 = vperm.xlu2 %3296, %v371_v6   ;;  %v2882_v3 = vld [vmem:[%s4875_s3 + $0x80] sm:$0xf] }
  0x2f   : > { %3227 = vmatpush.bf16.msra.mxu2 %v2835_v52  ;;  %1246 = vmatpush.bf16.msra.mxu0 %v2835_v52 }
  0x30   : > { %3235 = vmatpush.bf16.msra.mxu3 %v2899_v55  ;;  %1335 = vmatpush.bf16.msra.mxu1 %v2899_v55 }
  0x33   : > { %3228 = vmatpush.bf16.msra.mxu2 %v2827_v60  ;;  %1247 = vmatpush.bf16.msra.mxu0 %v2827_v60 }
  0x34   : > { %3236 = vmatpush.bf16.msra.mxu3 %v2891_v62  ;;  %1336 = vmatpush.bf16.msra.mxu1 %v2891_v62 }
  0x35   : > { %3298 = vset.pattern.permute.xlu1 %v3435_v1 }
  0x36   : > { %491 = vperm.xlu1 %3298, %v372_v7   ;;  %700 = vperm.xlu0 %3297, %v372_v7   ;;  %v2883_v7 = vor.u32 %v3158_v5, %v2882_v3 }
  0x37   : > { %3299 = vset.pattern.permute.xlu2 %v3434_v0  ;;  %3229 = vmatpush.bf16.msra.mxu2 %v2819_v4 }
  0x38   : > { %696 = vperm.xlu2 %3299, %v371_v6   ;;  %v351_v6 = vld [vmem:[%s3553_s17] sm:$0xff]  ;;  %3237 = vmatpush.bf16.msra.mxu3 %v2883_v7 }
  0x39   : > { %1248 = vmatpush.bf16.msra.mxu0 %v2819_v4  ;;  %1337 = vmatpush.bf16.msra.mxu1 %v2883_v7 }
  0x3e   : > { %496 = vperm.xlu1 %3298, %v373_v8   ;;  %704 = vperm.xlu0 %3297, %v373_v8  }
  0x40   : > { %3300 = vset.pattern.permute.xlu2 %v3435_v1 }
  0x41   : > { %501 = vperm.xlu2 %3300, %v374_v9  }
  0x46   : > { %3301 = vset.pattern.permute.xlu1 %v3434_v0  ;;  %3302 = vset.pattern.permute.xlu0 %v3435_v1 }
  0x47   : > { %708 = vperm.xlu1 %3301, %v374_v9   ;;  %511 = vperm.xlu0 %3302, %v376_v10   ;;  %v3155_v9 = vld [vmem:[%s4875_s3 + $0x74] sm:$0xf] }
  0x49   : > { %506 = vperm.xlu2 %3300, %v375_v11  }
  0x4f   : > { %712 = vperm.xlu1 %3301, %v375_v11   ;;  %3306 = vset.pattern.permute.xlu0 %v3434_v0  ;;  %v3171_v11 = vld [vmem:[%s4875_s3 + $0xf4] sm:$0xf] }
  0x50   : > { %720 = vperm.xlu0 %3306, %v377_v12  }
  0x51   : > { %3303 = vset.pattern.permute.xlu2 %v3434_v0 }
  0x52   : > { %716 = vperm.xlu2 %3303, %v376_v10   ;;  %v2876_v10 = vld [vmem:[%s4875_s3 + $0x78] sm:$0xf0] }
  0x57   : > { %3304 = vset.pattern.permute.xlu1 %v3435_v1 }
  0x58   : > { %516 = vperm.xlu1 %3304, %v377_v12   ;;  %732 = vperm.xlu0 %3306, %v380_v13   ;;  %v2879_v12 = vor.u32 %v3155_v9, %v2876_v10 }
  0x5a   : > { %3305 = vset.pattern.permute.xlu2 %v3435_v1  ;;  %1419 = vmatpush.bf16.msrb.mxu2 %v2879_v12 }
  0x5b   : > { %521 = vperm.xlu2 %3305, %v378_v14  }
  0x5e   : > { %1420 = vmatpush.bf16.msrb.mxu2 %v2871_v39 }
  0x60   : > { %3307 = vset.pattern.permute.xlu1 %v3434_v0  ;;  %736 = vperm.xlu0 %3306, %v381_v21  }
  0x61   : > { %724 = vperm.xlu1 %3307, %v378_v14   ;;  %v3710_v14 = vld [vmem:[%s3553_s17 + $0x28] sm:$0xff] }
  0x63   : > { %526 = vperm.xlu2 %3305, %v379_v22  }
  0x68   : > { %3312 = vset.pattern.permute.xlu0 %v3435_v1 }
  0x69   : > { %3308 = vset.pattern.permute.xlu1 %v3435_v1  ;;  %391 = vperm.xlu0 %3312, %v3615_v32  }
  0x6a   : > { %531 = vperm.xlu1 %3308, %v380_v13   ;;  %v2940_v13 = vld [vmem:[%s4875_s3 + $0xf8] sm:$0xf0] }
  0x6b   : > { %3309 = vset.pattern.permute.xlu2 %v3434_v0  ;;  %v2943_v15 = vor.u32 %v3171_v11, %v2940_v13 }
  0x6c   : > { %728 = vperm.xlu2 %3309, %v379_v22   ;;  %v3723_v22 = vld [vmem:[%s3553_s17 + $0x30] sm:$0xff] }
  0x6d   : > { %1508 = vmatpush.bf16.msrb.mxu3 %v2943_v15  ;;  %v3151_v15 = vld [vmem:[%s4875_s3 + $0x54] sm:$0xf] }
  0x71   : > { %3316 = vset.pattern.permute.xlu0 %v3434_v0  ;;  %1509 = vmatpush.bf16.msrb.mxu3 %v2935_v42 }
  0x72   : > { %536 = vperm.xlu1 %3308, %v381_v21   ;;  %624 = vperm.xlu0 %3316, %v3646_v45   ;;  %v744_v21 = vperm.slane %v383_v16, 3  ;;  %v2860_v16 = vld [vmem:[%s4875_s3 + $0x58] sm:$0xf0] }
  0x73   : > { %v2863_v18 = vor.u32 %v3151_v15, %v2860_v16 }
  0x74   : > { %3310 = vset.pattern.permute.xlu2 %v3435_v1  ;;  %v3732_v26 = vperm.slane %v744_v21, 1 }
  0x75   : > { %541 = vperm.xlu2 %3310, %v382_v49   ;;  %1421 = vmatpush.bf16.msrb.mxu2 %v2863_v18 }
  0x78   : > { %v3667_v56 = vpop.permute.xlu2 %476 }
  0x7a   : > { %3311 = vset.pattern.permute.xlu1 %v3434_v0  ;;  %636 = vperm.xlu0 %3316, %v3710_v14  }
  0x7b   : > { %740 = vperm.xlu1 %3311, %v382_v49  }
  0x7d   : > { %386 = vperm.xlu2 %3310, %v351_v6  }
  0x80   : > { %v3695_v8 = vpop.permute.xlu2 %481 }
  0x81   : > { %v589_v3 = vmul.f32 %v3726_v23, %v3695_v8  ;;  %v590_v4 = vmul.f32 %v3728_v24, %v3695_v8  ;;  %v587_v8 = vmul.f32 %v3726_v23, %v3667_v56 }
  0x82   : > { %640 = vperm.xlu0 %3316, %v3723_v22  }
  0x83   : > { %616 = vperm.xlu1 %3311, %v351_v6  }
  0x85   : > { %3313 = vset.pattern.permute.xlu2 %v3434_v0 }
  0x86   : > { %620 = vperm.xlu2 %3313, %v3615_v32  }
  0x88   : > { %v3718_v17 = vpop.permute.xlu2 %486 }
  0x8a   : > { %3322 = vset.pattern.permute.xlu0 %v3435_v1 }
  0x8b   : > { %3314 = vset.pattern.permute.xlu1 %v3435_v1 }
  0x8c   : > { %396 = vperm.xlu1 %3314, %v3646_v45   ;;  %v3760_v45 = vperm.slane %v877_v34, 0 }
  0x8e   : > { %3315 = vset.pattern.permute.xlu2 %v3435_v1 }
  0x8f   : > { %v681_v28 = vpop.permute.xlu1 %680  ;;  %v467_v29 = vpop.permute.xlu0 %466  ;;  %401 = vperm.xlu2 %3315, %v354_v27  }
  0x90   : > { %v781_v30 = vmul.f32 %v3730_v25, %v681_v28  ;;  %v782_v31 = vmul.f32 %v3732_v26, %v681_v28  ;;  %v583_v32 = vmul.f32 %v3726_v23, %v467_v29  ;;  %v584_v33 = vmul.f32 %v3728_v24, %v467_v29  ;;  %v360_v29 = vld [vmem:[%s3553_s17 + $0x48] sm:$0xff] }
  0x91   : > { %431 = vperm.xlu0 %3322, %v360_v29  }
  0x92   : > { %v3743_v35 = vpop.permute.xlu2 %696  ;;  %v845_v43 = vadd.f32 %v781_v30, %v583_v32  ;;  %v846_v44 = vadd.f32 %v782_v31, %v584_v33 }
  0x94   : > { %3317 = vset.pattern.permute.xlu1 %v3434_v0  ;;  %v915_v55 = vadd.f32 %v3760_v45, %v845_v43  ;;  %v916_v57 = vadd.f32 %v3762_v46, %v846_v44  ;;  %v361_v43 = vld [vmem:[%s3553_s17 + $0x50] sm:$0xff] }
  0x95   : > { %628 = vperm.xlu1 %3317, %v354_v27  }
  0x96   : > { %v979_v61 = vmax.f32 %v915_v55, 0.0  ;;  %v980_v63 = vmax.f32 %v916_v57, 0.0  ;;  %v591_v55 = vmul.f32 %v3726_v23, %v3718_v17  ;;  %v592_v57 = vmul.f32 %v3728_v24, %v3718_v17  ;;  %v3165_v17 = vld [vmem:[%s4875_s3 + $0xc4] sm:$0xf] }
  0x97   : > { %v685_v47 = vpop.permute.xlu1 %684  ;;  %v472_v48 = vpop.permute.xlu0 %471  ;;  %406 = vperm.xlu2 %3315, %v355_v41  }
  0x98   : > { %v783_v49 = vmul.f32 %v3730_v25, %v685_v47  ;;  %v784_v50 = vmul.f32 %v3732_v26, %v685_v47  ;;  %v585_v51 = vmul.f32 %v3726_v23, %v472_v48  ;;  %v586_v52 = vmul.f32 %v3728_v24, %v472_v48 }
  0x99   : > { %3326 = vset.pattern.permute.xlu0 %v3434_v0 }
  0x9a   : > { %v847_v53 = vadd.f32 %v783_v49, %v585_v51  ;;  %v848_v54 = vadd.f32 %v784_v50, %v586_v52  ;;  %656 = vperm.xlu0 %3326, %v361_v43  }
  0x9b   : > { %v3770_v58 = vpop.permute.xlu2 %501 }
  0x9c   : > { %v917_v59 = vadd.f32 %v3760_v45, %v847_v53  ;;  %v918_v60 = vadd.f32 %v3762_v46, %v848_v54  ;;  %v359_v54 = vld [vmem:[%s3553_s17 + $0x40] sm:$0xff] }
  0x9d   : > { %3318 = vset.pattern.permute.xlu1 %v3435_v1 }
  0x9e   : > { %v981_v62 = vmax.f32 %v917_v59, 0.0  ;;  %v982_v2 = vmax.f32 %v918_v60, 0.0  ;;  %411 = vperm.xlu1 %3318, %v3710_v14   ;;  %v588_v14 = vmul.f32 %v3728_v24, %v3667_v56  ;;  %v2924_v56 = vld [vmem:[%s4875_s3 + $0xd8] sm:$0xf0]  ;;  %v789_v59 = vmul.f32 %v3730_v25, %v3743_v35 }
  0x9f   : > { %v693_v5 = vpop.permute.xlu1 %692  ;;  %3319 = vset.pattern.permute.xlu2 %v3434_v0  ;;  %v2927_v31 = vor.u32 %v3167_v19, %v2924_v56  ;;  %v790_v60 = vmul.f32 %v3732_v26, %v3743_v35  ;;  %v2916_v35 = vld [vmem:[%s4875_s3 + $0xc8] sm:$0xf0] }
  0xa0   : > { %v787_v6 = vmul.f32 %v3730_v25, %v693_v5  ;;  %v788_v7 = vmul.f32 %v3732_v26, %v693_v5  ;;  %v689_v9 = vpop.permute.xlu0 %688  ;;  %v3783_v10 = vpack.c.bf16 %v981_v62, %v979_v61  ;;  %v3785_v11 = vpack.c.bf16 %v982_v2, %v980_v63  ;;  %632 = vperm.xlu2 %3319, %v355_v41   ;;  %v3149_v61 = vld [vmem:[%s4875_s3 + $0x44] sm:$0xf]  ;;  %v2852_v62 = vld [vmem:[%s4875_s3 + $0x48] sm:$0xf0] }
  0xa1   : > { %v785_v12 = vmul.f32 %v3730_v25, %v689_v9  ;;  %v786_v13 = vmul.f32 %v3732_v26, %v689_v9  ;;  %1510 = vmatpush.bf16.msrb.mxu3 %v2927_v31  ;;  %v2855_v63 = vor.u32 %v3149_v61, %v2852_v62  ;;  %v853_v5 = vadd.f32 %v789_v59, %v591_v55  ;;  %v365_v62 = vld [vmem:[%s3553_s17 + $0x70] sm:$0xff] }
  0xa2   : > { %1289 = vmatmul.bf16.vlgmr.msra.gmra.mxu2 %v3783_v10  ;;  %1378 = vmatmul.bf16.vlgmr.msra.gmra.mxu3 %v3785_v11  ;;  %v851_v20 = vadd.f32 %v787_v6, %v589_v3  ;;  %v852_v21 = vadd.f32 %v788_v7, %v590_v4  ;;  %v2919_v4 = vor.u32 %v3165_v17, %v2916_v35 }
  0xa3   : > { %v849_v27 = vadd.f32 %v785_v12, %v587_v8  ;;  %v850_v28 = vadd.f32 %v786_v13, %v588_v14  ;;  %v3808_v30 = vpop.permute.xlu2 %506  ;;  %1422 = vmatpush.bf16.msrb.mxu2 %v2855_v63  ;;  %v854_v6 = vadd.f32 %v790_v60, %v592_v57  ;;  %v923_v8 = vadd.f32 %v3760_v45, %v853_v5 }
  0xa4   : > { %v921_v34 = vadd.f32 %v3760_v45, %v851_v20  ;;  %v922_v37 = vadd.f32 %v3762_v46, %v852_v21  ;;  %v597_v20 = vmul.f32 %v3726_v23, %v3770_v58  ;;  %v598_v21 = vmul.f32 %v3728_v24, %v3770_v58 }
  0xa5   : > { %v919_v33 = vadd.f32 %v3760_v45, %v849_v27  ;;  %v920_v36 = vadd.f32 %v3762_v46, %v850_v28  ;;  %1511 = vmatpush.bf16.msrb.mxu3 %v2919_v4  ;;  %v924_v14 = vadd.f32 %v3762_v46, %v854_v6  ;;  %v987_v18 = vmax.f32 %v923_v8, 0.0 }
  0xa6   : > { %416 = vperm.xlu1 %3318, %v3723_v22   ;;  %v985_v40 = vmax.f32 %v921_v34, 0.0  ;;  %v986_v42 = vmax.f32 %v922_v37, 0.0  ;;  %v3147_v37 = vld [vmem:[%s4875_s3 + $0x34] sm:$0xf] }
  0xa7   : > { %v983_v39 = vmax.f32 %v919_v33, 0.0  ;;  %v984_v41 = vmax.f32 %v920_v36, 0.0  ;;  %v988_v19 = vmax.f32 %v924_v14, 0.0 }
  0xa8   : > { %v492_v32 = vpop.permute.xlu1 %491  ;;  %3320 = vset.pattern.permute.xlu2 %v3435_v1  ;;  %v701_v22 = vpop.permute.xlu0 %700 }
  0xa9   : > { %421 = vperm.xlu2 %3320, %v358_v38   ;;  %v593_v44 = vmul.f32 %v3726_v23, %v492_v32  ;;  %v594_v47 = vmul.f32 %v3728_v24, %v492_v32  ;;  %v791_v49 = vmul.f32 %v3730_v25, %v701_v22  ;;  %v792_v50 = vmul.f32 %v3732_v26, %v701_v22  ;;  %v2908_v22 = vld [vmem:[%s4875_s3 + $0xb8] sm:$0xf0] }
  0xaa   : > { %v3826_v52 = vpack.c.bf16 %v985_v40, %v983_v39  ;;  %v3828_v53 = vpack.c.bf16 %v986_v42, %v984_v41  ;;  %v3163_v39 = vld [vmem:[%s4875_s3 + $0xb4] sm:$0xf]  ;;  %v362_v41 = vld [vmem:[%s3553_s17 + $0x58] sm:$0xff] }
  0xab   : > { %v855_v2 = vadd.f32 %v791_v49, %v593_v44  ;;  %v856_v3 = vadd.f32 %v792_v50, %v594_v47  ;;  %v2911_v49 = vor.u32 %v3163_v39, %v2908_v22 }
  0xac   : > { %v3822_v48 = vpop.permute.xlu2 %716 }
  0xad   : > { %v925_v7 = vadd.f32 %v3760_v45, %v855_v2  ;;  %v926_v9 = vadd.f32 %v3762_v46, %v856_v3  ;;  %1512 = vmatpush.bf16.msrb.mxu3 %v2911_v49  ;;  %v599_v2 = vmul.f32 %v3726_v23, %v3808_v30  ;;  %v600_v3 = vmul.f32 %v3728_v24, %v3808_v30 }
  0xae   : > { %3321 = vset.pattern.permute.xlu1 %v3434_v0  ;;  %v799_v6 = vmul.f32 %v3730_v25, %v3822_v48 }
  0xaf   : > { %644 = vperm.xlu1 %3321, %v358_v38   ;;  %v989_v15 = vmax.f32 %v925_v7, 0.0  ;;  %v990_v16 = vmax.f32 %v926_v9, 0.0  ;;  %v2844_v38 = vld [vmem:[%s4875_s3 + $0x38] sm:$0xf0]  ;;  %v800_v7 = vmul.f32 %v3732_v26, %v3822_v48  ;;  %v3145_v48 = vld [vmem:[%s4875_s3 + $0x24] sm:$0xf] }
  0xb0   : > { %v497_v51 = vpop.permute.xlu1 %496  ;;  %v705_v56 = vpop.permute.xlu0 %704  ;;  %v2847_v42 = vor.u32 %v3147_v37, %v2844_v38 }
  0xb1   : > { %426 = vperm.xlu2 %3320, %v359_v54   ;;  %v3867_v31 = vpack.c.bf16 %v989_v15, %v987_v18  ;;  %v595_v32 = vmul.f32 %v3726_v23, %v497_v51  ;;  %v596_v34 = vmul.f32 %v3728_v24, %v497_v51  ;;  %v793_v58 = vmul.f32 %v3730_v25, %v705_v56  ;;  %v2836_v18 = vld [vmem:[%s4875_s3 + $0x28] sm:$0xf0] }
  0xb2   : > { %1294 = vmatmul.bf16.gmra.mxu2 %v3826_v52  ;;  %1383 = vmatmul.bf16.gmra.mxu3 %v3828_v53  ;;  %v794_v36 = vmul.f32 %v3732_v26, %v705_v56 }
  0xb3   : > { %1423 = vmatpush.bf16.msrb.mxu2 %v2847_v42  ;;  %v857_v50 = vadd.f32 %v793_v58, %v595_v32 }
  0xb4   : > { %v858_v51 = vadd.f32 %v794_v36, %v596_v34 }
  0xb5   : > { %v3855_v13 = vpop.permute.xlu2 %521  ;;  %v927_v60 = vadd.f32 %v3760_v45, %v857_v50 }
  0xb6   : > { %v928_v61 = vadd.f32 %v3762_v46, %v858_v51  ;;  %v605_v50 = vmul.f32 %v3726_v23, %v3855_v13  ;;  %v606_v51 = vmul.f32 %v3728_v24, %v3855_v13  ;;  %v3143_v13 = vld [vmem:[%s4875_s3 + $0x14] sm:$0xf] }
  0xb7   : > { %648 = vperm.xlu1 %3321, %v359_v54   ;;  %v991_v4 = vmax.f32 %v927_v60, 0.0 }
  0xb8   : > { %v992_v5 = vmax.f32 %v928_v61, 0.0 }
  0xb9   : > { %v709_v12 = vpop.permute.xlu1 %708  ;;  %3323 = vset.pattern.permute.xlu2 %v3434_v0  ;;  %v512_v54 = vpop.permute.xlu0 %511 }
  0xba   : > { %652 = vperm.xlu2 %3323, %v360_v29   ;;  %v795_v27 = vmul.f32 %v3730_v25, %v709_v12  ;;  %v796_v28 = vmul.f32 %v3732_v26, %v709_v12  ;;  %v3869_v29 = vpack.c.bf16 %v990_v16, %v988_v19  ;;  %v601_v9 = vmul.f32 %v3726_v23, %v512_v54  ;;  %v3161_v19 = vld [vmem:[%s4875_s3 + $0xa4] sm:$0xf] }
  0xbb   : > { %v602_v12 = vmul.f32 %v3728_v24, %v512_v54 }
  0xbc   : > { %v859_v44 = vadd.f32 %v795_v27, %v597_v20  ;;  %v860_v47 = vadd.f32 %v796_v28, %v598_v21  ;;  %v863_v56 = vadd.f32 %v799_v6, %v601_v9  ;;  %v2839_v21 = vor.u32 %v3145_v48, %v2836_v18  ;;  %v2900_v27 = vld [vmem:[%s4875_s3 + $0xa8] sm:$0xf0]  ;;  %v363_v28 = vld [vmem:[%s3553_s17 + $0x60] sm:$0xff]  ;;  %v2892_v9 = vld [vmem:[%s4875_s3 + $0x98] sm:$0xf0] }
  0xbd   : > { %v3886_v40 = vpop.permute.xlu2 %526  ;;  %v864_v34 = vadd.f32 %v800_v7, %v602_v12  ;;  %v2903_v58 = vor.u32 %v3161_v19, %v2900_v27 }
  0xbe   : > { %v929_v55 = vadd.f32 %v3760_v45, %v859_v44  ;;  %v930_v57 = vadd.f32 %v3762_v46, %v860_v47  ;;  %1424 = vmatpush.bf16.msrb.mxu2 %v2839_v21  ;;  %v933_v38 = vadd.f32 %v3760_v45, %v863_v56 }
  0xbf   : > { %3324 = vset.pattern.permute.xlu1 %v3435_v1  ;;  %1513 = vmatpush.bf16.msrb.mxu3 %v2903_v58 }
  0xc0   : > { %436 = vperm.xlu1 %3324, %v361_v43   ;;  %v364_v43 = vld [vmem:[%s3553_s17 + $0x68] sm:$0xff]  ;;  %v993_v17 = vmax.f32 %v929_v55, 0.0  ;;  %v994_v63 = vmax.f32 %v930_v57, 0.0  ;;  %v997_v44 = vmax.f32 %v933_v38, 0.0 }
  0xc1   : > { %v713_v33 = vpop.permute.xlu1 %712  ;;  %668 = vperm.xlu0 %3326, %v364_v43  }
  0xc2   : > { %1299 = vmatmul.bf16.gmra.mxu2 %v3867_v31  ;;  %1388 = vmatmul.bf16.gmra.mxu3 %v3869_v29  ;;  %v721_v8 = vpop.permute.xlu0 %720  ;;  %v797_v14 = vmul.f32 %v3730_v25, %v713_v33  ;;  %v798_v15 = vmul.f32 %v3732_v26, %v713_v33  ;;  %v3914_v16 = vpack.c.bf16 %v993_v17, %v991_v4  ;;  %v3159_v4 = vld [vmem:[%s4875_s3 + $0x94] sm:$0xf] }
  0xc3   : > { %3325 = vset.pattern.permute.xlu2 %v3435_v1  ;;  %v3916_v30 = vpack.c.bf16 %v994_v63, %v992_v5  ;;  %v801_v57 = vmul.f32 %v3730_v25, %v721_v8  ;;  %v802_v60 = vmul.f32 %v3732_v26, %v721_v8  ;;  %v2895_v48 = vor.u32 %v3159_v4, %v2892_v9 }
  0xc4   : > { %441 = vperm.xlu2 %3325, %v362_v41   ;;  %v861_v32 = vadd.f32 %v797_v14, %v599_v2  ;;  %v862_v33 = vadd.f32 %v798_v15, %v600_v3  ;;  %v366_v3 = vld [vmem:[%s3553_s17 + $0x78] sm:$0xff]  ;;  %s341_s17 = sand.u32 1, %s3421_s10  }
  0xc5   : > { %1514 = vmatpush.bf16.msrb.mxu3 %v2895_v48  ;;  %s2813_s22 = sshll.u32 %s341_s17, 8  ;;  %s2718_s13 = scalar_lea.sflag [#allocation4], %s341_s17 }
  0xc6   : > { %v3900_v35 = vpop.permute.xlu2 %728  ;;  %v931_v37 = vadd.f32 %v3760_v45, %v861_v32  ;;  %v932_v39 = vadd.f32 %v3762_v46, %v862_v33  ;;  %s4753_s23 = scalar_lea.vmem [#allocation5], %s2813_s22 }
  0xc7   : > { %v805_v58 = vmul.f32 %v3730_v25, %v3900_v35  ;;  %s2730_s28 = sshll.u32 %s4753_s23, 4  ;;  %s2731_s28 = int_to_ptr.vmem [resolvable:$true] %s2730_s28 }
  0xc8   : > { %3327 = vset.pattern.permute.xlu1 %v3434_v0  ;;  %v996_v47 = vmax.f32 %v932_v39, 0.0 }
  0xc9   : > { %660 = vperm.xlu1 %3327, %v362_v41   ;;  %672 = vperm.xlu0 %3326, %v365_v62   ;;  %v934_v41 = vadd.f32 %v3762_v46, %v864_v34  ;;  %v608_v34 = vmul.f32 %v3728_v24, %v3886_v40 }
  0xca   : > { %v517_v59 = vpop.permute.xlu1 %516  ;;  %v3940_v42 = vpop.permute.xlu0 %732 }
  0xcb   : > { %v998_v49 = vmax.f32 %v934_v41, 0.0  ;;  %v603_v54 = vmul.f32 %v3726_v23, %v517_v59  ;;  %v604_v55 = vmul.f32 %v3728_v24, %v517_v59  ;;  %v2828_v59 = vld [vmem:[%s4875_s3 + $0x18] sm:$0xf0] }
  0xcc   : > { %446 = vperm.xlu2 %3325, %v363_v28   ;;  %v2831_v15 = vor.u32 %v3143_v13, %v2828_v59 }
  0xcd   : > { %v3955_v63 = vpack.c.bf16 %v998_v49, %v996_v47  ;;  %v865_v5 = vadd.f32 %v801_v57, %v603_v54  ;;  %v866_v6 = vadd.f32 %v802_v60, %v604_v55  ;;  %v807_v49 = vmul.f32 %v3730_v25, %v3940_v42 }
  0xce   : > { %1425 = vmatpush.bf16.msrb.mxu2 %v2831_v15 }
  0xcf   : > { %v3934_v36 = vpop.permute.xlu2 %541  ;;  %v935_v18 = vadd.f32 %v3760_v45, %v865_v5  ;;  %v936_v19 = vadd.f32 %v3762_v46, %v866_v6  ;;  %v2884_v5 = vld [vmem:[%s4875_s3 + $0x88] sm:$0xf0] }
  0xd1   : > { %3328 = vset.pattern.permute.xlu1 %v3435_v1  ;;  %v999_v27 = vmax.f32 %v935_v18, 0.0  ;;  %v1000_v32 = vmax.f32 %v936_v19, 0.0 }
  0xd2   : > { %1304 = vmatmul.bf16.gmra.mxu2 %v3914_v16  ;;  %1393 = vmatmul.bf16.gmra.mxu3 %v3916_v30  ;;  %v3969_v7 = vpop.permute.xlu0 %736 }
  0xd3   : > { %v725_v20 = vpop.permute.xlu1 %724  ;;  %451 = vperm.xlu1 %3328, %v364_v43   ;;  %v995_v43 = vmax.f32 %v931_v37, 0.0  ;;  %v806_v37 = vmul.f32 %v3732_v26, %v3900_v35  ;;  %v808_v35 = vmul.f32 %v3732_v26, %v3940_v42  ;;  %v2820_v42 = vld [vmem:[%s4875_s3 + $0x8] sm:$0xf0] }
  0xd4   : > { %3329 = vset.pattern.permute.xlu2 %v3434_v0  ;;  %v803_v61 = vmul.f32 %v3730_v25, %v725_v20 }
  0xd5   : > { %664 = vperm.xlu2 %3329, %v363_v28   ;;  %v3953_v17 = vpack.c.bf16 %v997_v44, %v995_v43  ;;  %v870_v60 = vadd.f32 %v806_v37, %v608_v34 }
  0xd6   : > { %v867_v12 = vadd.f32 %v803_v61, %v605_v50 }
  0xd7   : > { %v387_v2 = vpop.permute.xlu2 %386 }
  0xd8   : > { %v551_v13 = vmul.f32 %v3726_v23, %v387_v2  ;;  %v552_v59 = vmul.f32 %v3728_v24, %v387_v2 }
  0xdb   : > { %456 = vperm.xlu1 %3328, %v365_v62   ;;  %v804_v62 = vmul.f32 %v3732_v26, %v725_v20  ;;  %v392_v20 = vpop.permute.xlu0 %391 }
  0xdc   : > { %v532_v22 = vpop.permute.xlu1 %531  ;;  %v553_v39 = vmul.f32 %v3726_v23, %v392_v20  ;;  %v554_v41 = vmul.f32 %v3728_v24, %v392_v20 }
  0xdd   : > { %v868_v8 = vadd.f32 %v804_v62, %v606_v51  ;;  %3330 = vset.pattern.permute.xlu2 %v3435_v1  ;;  %v607_v1 = vmul.f32 %v3726_v23, %v3886_v40  ;;  %v609_v47 = vmul.f32 %v3726_v23, %v532_v22  ;;  %v610_v40 = vmul.f32 %v3728_v24, %v532_v22  ;;  %v3141_v62 = vld [vmem:[%s4875_s3 + $0x4] sm:$0xf] }
  0xde   : > { %461 = vperm.xlu2 %3330, %v366_v3   ;;  %v2823_v4 = vor.u32 %v3141_v62, %v2820_v42 }
  0xdf   : > { %v938_v56 = vadd.f32 %v3762_v46, %v868_v8  ;;  %v869_v57 = vadd.f32 %v805_v58, %v607_v1  ;;  %v871_v61 = vadd.f32 %v807_v49, %v609_v47  ;;  %v872_v22 = vadd.f32 %v808_v35, %v610_v40 }
  0xe0   : > { %v621_v21 = vpop.permute.xlu2 %620  ;;  %1426 = vmatpush.bf16.msrb.mxu2 %v2823_v4  ;;  %v614_v47 = vmul.f32 %v3728_v24, %v3934_v36  ;;  %v809_v40 = vmul.f32 %v3730_v25, %v3969_v7 }
  0xe1   : > { %v1002_v33 = vmax.f32 %v938_v56, 0.0  ;;  %v751_v43 = vmul.f32 %v3730_v25, %v621_v21  ;;  %v752_v44 = vmul.f32 %v3732_v26, %v621_v21  ;;  %v939_v18 = vadd.f32 %v3760_v45, %v869_v57 }
  0xe2   : > { %1309 = vmatmul.bf16.gmra.mxu2 %v3953_v17  ;;  %1398 = vmatmul.bf16.gmra.mxu3 %v3955_v63  ;;  %v941_v2 = vadd.f32 %v3760_v45, %v871_v61  ;;  %v942_v19 = vadd.f32 %v3762_v46, %v872_v22 }
  0xe3   : > { %3331 = vset.pattern.permute.xlu1 %v3434_v0  ;;  %v937_v0 = vadd.f32 %v3760_v45, %v867_v12  ;;  %v4004_v51 = vpack.c.bf16 %v1002_v33, %v1000_v32  ;;  %v815_v54 = vadd.f32 %v751_v43, %v553_v39  ;;  %v816_v55 = vadd.f32 %v752_v44, %v554_v41 }
  0xe4   : > { %v3975_v14 = vpop.permute.xlu1 %536  ;;  %676 = vperm.xlu1 %3331, %v366_v3   ;;  %v3157_v3 = vld [vmem:[%s4875_s3 + $0x84] sm:$0xf]  ;;  %v1003_v1 = vmax.f32 %v939_v18, 0.0  ;;  %v1005_v34 = vmax.f32 %v941_v2, 0.0  ;;  %v1006_v37 = vmax.f32 %v942_v19, 0.0  ;;  %v625_v43 = vpop.permute.xlu0 %624  ;;  %v613_v44 = vmul.f32 %v3726_v23, %v3934_v36 }
  0xe5   : > { %v1001_v28 = vmax.f32 %v937_v0, 0.0  ;;  %v2887_v9 = vor.u32 %v3157_v3, %v2884_v5  ;;  %v885_v15 = vadd.f32 %v3760_v45, %v815_v54  ;;  %v886_v48 = vadd.f32 %v3762_v46, %v816_v55 }
  0xe6   : > { %v940_v0 = vadd.f32 %v3762_v46, %v870_v60  ;;  %v4044_v57 = vpack.c.bf16 %v1005_v34, %v1003_v1  ;;  %v753_v61 = vmul.f32 %v3730_v25, %v625_v43  ;;  %v754_v62 = vmul.f32 %v3732_v26, %v625_v43 }
  0xe7   : > { %v4002_v50 = vpack.c.bf16 %v1001_v28, %v999_v27  ;;  %1515 = vmatpush.bf16.msrb.mxu3 %v2887_v9  ;;  %v949_v28 = vmax.f32 %v885_v15, 0.0  ;;  %v950_v33 = vmax.f32 %v886_v48, 0.0  ;;  %v611_v42 = vmul.f32 %v3726_v23, %v3975_v14 }
  0xe8   : > { %v1004_v58 = vmax.f32 %v940_v0, 0.0  ;;  %v612_v3 = vmul.f32 %v3728_v24, %v3975_v14  ;;  %v3004_v14 = vld [vmem:[%s4877_s5 + $0x78] sm:$0xf0] }
  0xe9   : > { %v402_v56 = vpop.permute.xlu2 %401  ;;  %v873_v15 = vadd.f32 %v809_v40, %v611_v42 }
  0xea   : > { %v4046_v60 = vpack.c.bf16 %v1006_v37, %v1004_v58  ;;  %v557_v0 = vmul.f32 %v3726_v23, %v402_v56  ;;  %v558_v19 = vmul.f32 %v3728_v24, %v402_v56 }
  0xeb   : > { %v943_v1 = vadd.f32 %v3760_v45, %v873_v15 }
  0xed   : > { %v3990_v38 = vpop.permute.xlu1 %740 }
  0xee   : > { %v811_v55 = vmul.f32 %v3730_v25, %v3990_v38 }
  0xf0   : > { %v875_v5 = vadd.f32 %v811_v55, %v613_v44  ;;  %v1007_v55 = vmax.f32 %v943_v1, 0.0 }
  0xf1   : > { %v407_v4 = vpop.permute.xlu2 %406 }
  0xf2   : > { %1314 = vmatmul.bf16.gmra.mxu2 %v4002_v50  ;;  %1403 = vmatmul.bf16.gmra.mxu3 %v4004_v51 }
  0xf5   : > { %v617_v6 = vpop.permute.xlu1 %616 }
  0xf6   : > { %v749_v12 = vmul.f32 %v3730_v25, %v617_v6  ;;  %v750_v8 = vmul.f32 %v3732_v26, %v617_v6  ;;  %v3187_v6 = vld [vmem:[%s4877_s5 + $0x74] sm:$0xf] }
  0xf8   : > { %v813_v20 = vadd.f32 %v749_v12, %v551_v13  ;;  %v814_v21 = vadd.f32 %v750_v8, %v552_v59  ;;  %v810_v13 = vmul.f32 %v3732_v26, %v3969_v7  ;;  %v812_v59 = vmul.f32 %v3732_v26, %v3990_v38  ;;  %v3203_v7 = vld [vmem:[%s4877_s5 + $0xf4] sm:$0xf]  ;;  %v3068_v8 = vld [vmem:[%s4877_s5 + $0xf8] sm:$0xf0] }
  0xf9   : > { %v3007_v12 = vor.u32 %v3187_v6, %v3004_v14  ;;  %v3071_v2 = vor.u32 %v3203_v7, %v3068_v8 }
  0xfa   : > { %v883_v27 = vadd.f32 %v3760_v45, %v813_v20  ;;  %v884_v32 = vadd.f32 %v3762_v46, %v814_v21  ;;  %v874_v48 = vadd.f32 %v810_v13, %v612_v3  ;;  %v876_v18 = vadd.f32 %v812_v59, %v614_v47 }
  0xfb   : > { %2069 = vmatpush.bf16.msra.mxu2 %v3007_v12  ;;  %v945_v21 = vadd.f32 %v3760_v45, %v875_v5  ;;  %2158 = vmatpush.bf16.msra.mxu3 %v3071_v2  ;;  %v560_v13 = vmul.f32 %v3728_v24, %v407_v4 }
  0xfc   : > { %v947_v39 = vmax.f32 %v883_v27, 0.0  ;;  %v948_v41 = vmax.f32 %v884_v32, 0.0  ;;  %v944_v34 = vadd.f32 %v3762_v46, %v874_v48  ;;  %v946_v58 = vadd.f32 %v3762_v46, %v876_v18 }
  0xfe   : > { %v397_v49 = vpop.permute.xlu1 %396  ;;  %v4038_v35 = vpack.c.bf16 %v949_v28, %v947_v39  ;;  %v4040_v54 = vpack.c.bf16 %v950_v33, %v948_v41  ;;  %v1009_v39 = vmax.f32 %v945_v21, 0.0  ;;  %v633_v41 = vpop.permute.xlu2 %632 }
  0xff   : > { %v555_v22 = vmul.f32 %v3726_v23, %v397_v49  ;;  %v556_v36 = vmul.f32 %v3728_v24, %v397_v49  ;;  %v637_v49 = vpop.permute.xlu0 %636  ;;  %v757_v3 = vmul.f32 %v3730_v25, %v633_v41  ;;  %v758_v6 = vmul.f32 %v3732_v26, %v633_v41 }
 0x100   : > { %1249 = vmatmul.bf16.vlgmr.msra.gmra.mxu0 %v4038_v35  ;;  %1338 = vmatmul.bf16.vlgmr.msra.gmra.mxu1 %v4040_v54  ;;  %v759_v59 = vmul.f32 %v3730_v25, %v637_v49  ;;  %v760_v5 = vmul.f32 %v3732_v26, %v637_v49  ;;  %v4096_v7 = vpack.c.bf16 %v1009_v39, %v1007_v55 }
 0x101   : > { %v817_v9 = vadd.f32 %v753_v61, %v555_v22  ;;  %v818_v38 = vadd.f32 %v754_v62, %v556_v36  ;;  %v1008_v61 = vmax.f32 %v944_v34, 0.0  ;;  %v1010_v22 = vmax.f32 %v946_v58, 0.0 }
 0x102   : > { %1319 = vmatmul.bf16.gmra.mxu2 %v4044_v57  ;;  %1408 = vmatmul.bf16.gmra.mxu3 %v4046_v60  ;;  %v559_v36 = vmul.f32 %v3726_v23, %v407_v4  ;;  %v822_v2 = vadd.f32 %v758_v6, %v560_v13 }
 0x103   : > { %v887_v32 = vadd.f32 %v3760_v45, %v817_v9  ;;  %v888_v33 = vadd.f32 %v3762_v46, %v818_v38  ;;  %v4100_v12 = vpack.c.bf16 %v1010_v22, %v1008_v61  ;;  %v4134_v22 = vld [vmem:[%s4876_s4] sm:$0x3] }
 0x104   : > { %v821_v4 = vadd.f32 %v757_v3, %v559_v36 }
 0x105   : > { %v951_v44 = vmax.f32 %v887_v32, 0.0  ;;  %v952_v40 = vmax.f32 %v888_v33, 0.0 }
 0x106   : > { %v891_v21 = vadd.f32 %v3760_v45, %v821_v4  ;;  %v422_v33 = vpop.permute.xlu2 %421  ;;  %v2994_v4 = vld [vmem:[%s4877_s5 + $0x60] sm:$0xf] }
 0x107   : > { %v629_v20 = vpop.permute.xlu1 %628 }
 0x108   : > { %v755_v27 = vmul.f32 %v3730_v25, %v629_v20  ;;  %v756_v28 = vmul.f32 %v3732_v26, %v629_v20  ;;  %v955_v34 = vmax.f32 %v891_v21, 0.0 }
 0x10a   : > { %v819_v56 = vadd.f32 %v755_v27, %v557_v0  ;;  %v820_v37 = vadd.f32 %v756_v28, %v558_v19  ;;  %v3002_v0 = vld [vmem:[%s4877_s5 + $0x70] sm:$0xf]  ;;  %v3188_v19 = vld [vmem:[%s4877_s5 + $0x74] sm:$0xf0]  ;;  %v892_v28 = vadd.f32 %v3762_v46, %v822_v2 }
 0x10b   : > { %v3003_v20 = vor.u32 %v3188_v19, %v3002_v0  ;;  %v3201_v0 = vld [vmem:[%s4877_s5 + $0xe4] sm:$0xf]  ;;  %v3060_v19 = vld [vmem:[%s4877_s5 + $0xe8] sm:$0xf0] }
 0x10c   : > { %v889_v43 = vadd.f32 %v3760_v45, %v819_v56  ;;  %v890_v47 = vadd.f32 %v3762_v46, %v820_v37  ;;  %v3066_v56 = vld [vmem:[%s4877_s5 + $0xf0] sm:$0xf]  ;;  %v3204_v37 = vld [vmem:[%s4877_s5 + $0xf4] sm:$0xf0]  ;;  %v956_v39 = vmax.f32 %v892_v28, 0.0  ;;  %v3063_v28 = vor.u32 %v3201_v0, %v3060_v19 }
 0x10d   : > { %1891 = vmatpush.bf16.msrb.mxu0 %v3003_v20 }
 0x10e   : > { %v953_v62 = vmax.f32 %v889_v43, 0.0  ;;  %v954_v42 = vmax.f32 %v890_v47, 0.0  ;;  %v641_v43 = vpop.permute.xlu0 %640  ;;  %v427_v13 = vpop.permute.xlu2 %426  ;;  %2159 = vmatpush.bf16.msra.mxu3 %v3063_v28 }
 0x10f   : > { %v761_v49 = vmul.f32 %v3730_v25, %v641_v43  ;;  %v762_v36 = vmul.f32 %v3732_v26, %v641_v43 }
 0x110   : > { %v4094_v14 = vpack.c.bf16 %v953_v62, %v951_v44  ;;  %v4098_v9 = vpack.c.bf16 %v954_v42, %v952_v40  ;;  %v412_v38 = vpop.permute.xlu1 %411  ;;  %v3067_v44 = vor.u32 %v3204_v37, %v3066_v56  ;;  %v565_v62 = vmul.f32 %v3726_v23, %v422_v33 }
 0x111   : > { %v561_v8 = vmul.f32 %v3726_v23, %v412_v38  ;;  %v562_v15 = vmul.f32 %v3728_v24, %v412_v38  ;;  %v566_v42 = vmul.f32 %v3728_v24, %v422_v33 }
 0x112   : > { %1254 = vmatmul.bf16.gmra.mxu0 %v4094_v14  ;;  %1324 = vmatmul.bf16.gmra.mxu2 %v4096_v7 }
 0x113   : > { %1343 = vmatmul.bf16.gmra.mxu1 %v4098_v9  ;;  %1413 = vmatmul.bf16.gmra.mxu3 %v4100_v12  ;;  %v823_v48 = vadd.f32 %v759_v59, %v561_v8  ;;  %v824_v18 = vadd.f32 %v760_v5, %v562_v15  ;;  %v4142_v59 = vperm.slane %v4134_v22, 0  ;;  %v3185_v15 = vld [vmem:[%s4877_s5 + $0x64] sm:$0xf] }
 0x114   : > { %1980 = vmatpush.bf16.msrb.mxu1 %v3067_v44  ;;  %v3058_v44 = vld [vmem:[%s4877_s5 + $0xe0] sm:$0xf] }
 0x115   : > { %v893_v27 = vadd.f32 %v3760_v45, %v823_v48  ;;  %v894_v32 = vadd.f32 %v3762_v46, %v824_v18 }
 0x116   : > { %v432_v43 = vpop.permute.xlu0 %431 }
 0x117   : > { %v957_v58 = vmax.f32 %v893_v27, 0.0  ;;  %v958_v41 = vmax.f32 %v894_v32, 0.0 }
 0x118   : > { %v417_v1 = vpop.permute.xlu1 %416 }
 0x119   : > { %v563_v47 = vmul.f32 %v3726_v23, %v417_v1  ;;  %v4125_v40 = vpack.c.bf16 %v957_v58, %v955_v34  ;;  %v564_v55 = vmul.f32 %v3728_v24, %v417_v1  ;;  %v4129_v61 = vpack.c.bf16 %v958_v41, %v956_v39 }
 0x11b   : > { %v825_v5 = vadd.f32 %v761_v49, %v563_v47  ;;  %v826_v8 = vadd.f32 %v762_v36, %v564_v55  ;;  %v3202_v47 = vld [vmem:[%s4877_s5 + $0xe4] sm:$0xf0]  ;;  %v653_v36 = vpop.permute.xlu2 %652 }
 0x11d   : > { %v895_v33 = vadd.f32 %v3760_v45, %v825_v5  ;;  %v896_v34 = vadd.f32 %v3762_v46, %v826_v8  ;;  %v567_v5 = vmul.f32 %v3726_v23, %v427_v13 }
 0x11f   : > { %v959_v39 = vmax.f32 %v895_v33, 0.0  ;;  %v960_v49 = vmax.f32 %v896_v34, 0.0  ;;  %v2986_v33 = vld [vmem:[%s4877_s5 + $0x50] sm:$0xf] }
 0x121   : > { %v645_v3 = vpop.permute.xlu1 %644 }
 0x122   : > { %1259 = vmatmul.bf16.gmra.mxu0 %v4125_v40  ;;  %1427 = vmatmul.bf16.vlgmr.msrb.gmra.mxu2 %v4038_v35  ;;  %v763_v6 = vmul.f32 %v3730_v25, %v645_v3  ;;  %v764_v38 = vmul.f32 %v3732_v26, %v645_v3  ;;  %v2996_v35 = vld [vmem:[%s4877_s5 + $0x68] sm:$0xf0] }
 0x123   : > { %1348 = vmatmul.bf16.gmra.mxu1 %v4129_v61  ;;  %1516 = vmatmul.bf16.vlgmr.msrb.gmra.mxu3 %v4040_v54  ;;  %v2999_v2 = vor.u32 %v3185_v15, %v2996_v35  ;;  %v3186_v54 = vld [vmem:[%s4877_s5 + $0x64] sm:$0xf0] }
 0x124   : > { %v827_v48 = vadd.f32 %v763_v6, %v565_v62  ;;  %v828_v18 = vadd.f32 %v764_v38, %v566_v42  ;;  %v2995_v27 = vor.u32 %v3186_v54, %v2994_v4  ;;  %v3059_v62 = vor.u32 %v3202_v47, %v3058_v44  ;;  %v442_v44 = vpop.permute.xlu2 %441 }
 0x125   : > { %v1290_v20 = vpop.f32.mrf.mxu2  ;;  %v1379_v21 = vpop.f32.mrf.mxu3  ;;  %2070 = vmatpush.bf16.msra.mxu2 %v2999_v2  ;;  %v568_v6 = vmul.f32 %v3728_v24, %v427_v13  ;;  %v569_v38 = vmul.f32 %v3726_v23, %v432_v43  ;;  %v767_v4 = vmul.f32 %v3730_v25, %v653_v36  ;;  %v768_v54 = vmul.f32 %v3732_v26, %v653_v36 }
 0x126   : > { %v1291_v32 = vadd.f32 %v1290_v20, %v4142_v59  ;;  %v897_v1 = vadd.f32 %v3760_v45, %v827_v48  ;;  %v898_v58 = vadd.f32 %v3762_v46, %v828_v18  ;;  %1892 = vmatpush.bf16.msrb.mxu0 %v2995_v27  ;;  %1981 = vmatpush.bf16.msrb.mxu1 %v3059_v62  ;;  %v657_v36 = vpop.permute.xlu0 %656  ;;  %v3050_v62 = vld [vmem:[%s4877_s5 + $0xd0] sm:$0xf] }
 0x127   : > { %v570_v18 = vmul.f32 %v3728_v24, %v432_v43 }
 0x128   : > { %v1380_v56 = vadd.f32 %v1379_v21, %v1291_v32  ;;  %v961_v41 = vmax.f32 %v897_v1, 0.0  ;;  %v962_v55 = vmax.f32 %v898_v58, 0.0  ;;  %v831_v21 = vadd.f32 %v767_v4, %v569_v38  ;;  %v3184_v1 = vld [vmem:[%s4877_s5 + $0x54] sm:$0xf0] }
 0x129   : > { %v649_v37 = vpop.permute.xlu1 %648  ;;  %v832_v32 = vadd.f32 %v768_v54, %v570_v18  ;;  %v2987_v34 = vor.u32 %v3184_v1, %v2986_v33  ;;  %v769_v4 = vmul.f32 %v3730_v25, %v657_v36  ;;  %v770_v18 = vmul.f32 %v3732_v26, %v657_v36 }
 0x12a   : > { %v4181_v15 = vpack.c.bf16 %v961_v41, %v959_v39  ;;  %v765_v35 = vmul.f32 %v3730_v25, %v649_v37  ;;  %v4185_v48 = vpack.c.bf16 %v962_v55, %v960_v49  ;;  %v766_v2 = vmul.f32 %v3732_v26, %v649_v37 }
 0x12b   : > { %v1629_v0 = vmax.f32 %v1380_v56, 0.0  ;;  %1893 = vmatpush.bf16.msrb.mxu0 %v2987_v34  ;;  %v902_v43 = vadd.f32 %v3762_v46, %v832_v32  ;;  %v574_v32 = vmul.f32 %v3728_v24, %v442_v44 }
 0x12c   : > { %v829_v20 = vadd.f32 %v765_v35, %v567_v5  ;;  %v830_v28 = vadd.f32 %v766_v2, %v568_v6  ;;  %v573_v2 = vmul.f32 %v3726_v23, %v442_v44  ;;  %v447_v1 = vpop.permute.xlu2 %446  ;;  %v3182_v44 = vld [vmem:[%s4877_s5 + $0x44] sm:$0xf0] }
 0x12d   : > { %v1292_v42 = vpop.f32.mrf.mxu2  ;;  %v1381_v3 = vpop.f32.mrf.mxu3  ;;  %v966_v5 = vmax.f32 %v902_v43, 0.0 }
 0x12e   : > { %v1293_v8 = vadd.f32 %v1292_v42, %v4142_v59  ;;  %v899_v39 = vadd.f32 %v3760_v45, %v829_v20  ;;  %v900_v41 = vadd.f32 %v3762_v46, %v830_v28  ;;  %v3200_v42 = vld [vmem:[%s4877_s5 + $0xd4] sm:$0xf0] }
 0x12f   : > { %v3051_v38 = vor.u32 %v3200_v42, %v3050_v62 }
 0x130   : > { %v1382_v13 = vadd.f32 %v1381_v3, %v1293_v8  ;;  %v963_v49 = vmax.f32 %v899_v39, 0.0  ;;  %v964_v3 = vmax.f32 %v900_v41, 0.0  ;;  %v2988_v41 = vld [vmem:[%s4877_s5 + $0x58] sm:$0xf0] }
 0x131   : > { %1982 = vmatpush.bf16.msrb.mxu1 %v3051_v38 }
 0x132   : > { %v1631_v19 = vmax.f32 %v1382_v13, 0.0  ;;  %1264 = vmatmul.bf16.gmra.mxu0 %v4181_v15  ;;  %1432 = vmatmul.bf16.gmra.mxu2 %v4094_v14  ;;  %v437_v27 = vpop.permute.xlu1 %436 }
 0x133   : > { %1353 = vmatmul.bf16.gmra.mxu1 %v4185_v48  ;;  %1521 = vmatmul.bf16.gmra.mxu3 %v4098_v9  ;;  %v901_v9 = vadd.f32 %v3760_v45, %v831_v21  ;;  %v571_v13 = vmul.f32 %v3726_v23, %v437_v27  ;;  %v572_v20 = vmul.f32 %v3728_v24, %v437_v27 }
 0x134   : > { %v4200_v58 = vpack.c.bf16 %v1631_v19, %v1629_v0  ;;  %v4222_v21 = vpack.c.bf16 %v966_v5, %v964_v3 }
 0x135   : > { %v1295_v14 = vpop.f32.mrf.mxu2  ;;  %v1384_v56 = vpop.f32.mrf.mxu3  ;;  %v965_v55 = vmax.f32 %v901_v9, 0.0  ;;  %v834_v27 = vadd.f32 %v770_v18, %v572_v20  ;;  %v3183_v9 = vld [vmem:[%s4877_s5 + $0x54] sm:$0xf] }
 0x136   : > { %v1296_v37 = vadd.f32 %v1295_v14, %v4142_v59  ;;  %v2991_v43 = vor.u32 %v3183_v9, %v2988_v41 }
 0x137   : > { %v4218_v0 = vpack.c.bf16 %v965_v55, %v963_v49  ;;  %v904_v38 = vadd.f32 %v3762_v46, %v834_v27 }
 0x138   : > { %v1385_v47 = vadd.f32 %v1384_v56, %v1296_v37  ;;  %v833_v56 = vadd.f32 %v769_v4, %v571_v13  ;;  %2071 = vmatpush.bf16.msra.mxu2 %v2991_v43  ;;  %v3042_v13 = vld [vmem:[%s4877_s5 + $0xc0] sm:$0xf] }
 0x139   : > { %v968_v20 = vmax.f32 %v904_v38, 0.0  ;;  %v2970_v38 = vld [vmem:[%s4877_s5 + $0x30] sm:$0xf] }
 0x13a   : > { %v1633_v34 = vmax.f32 %v1385_v47, 0.0  ;;  %v3052_v47 = vld [vmem:[%s4877_s5 + $0xd8] sm:$0xf0]  ;;  %v903_v5 = vadd.f32 %v3760_v45, %v833_v56  ;;  %v575_v56 = vmul.f32 %v3726_v23, %v447_v1 }
 0x13b   : > { %v661_v6 = vpop.permute.xlu1 %660 }
 0x13c   : > { %v771_v19 = vmul.f32 %v3730_v25, %v661_v6  ;;  %v772_v28 = vmul.f32 %v3732_v26, %v661_v6  ;;  %v967_v18 = vmax.f32 %v903_v5, 0.0 }
 0x13d   : > { %v1297_v8 = vpop.f32.mrf.mxu2  ;;  %v1386_v35 = vpop.f32.mrf.mxu3 }
 0x13e   : > { %v1298_v54 = vadd.f32 %v1297_v8, %v4142_v59  ;;  %v835_v37 = vadd.f32 %v771_v19, %v573_v2  ;;  %v836_v39 = vadd.f32 %v772_v28, %v574_v32  ;;  %v3198_v19 = vld [vmem:[%s4877_s5 + $0xc4] sm:$0xf0]  ;;  %v665_v32 = vpop.permute.xlu2 %664 }
 0x140   : > { %v1387_v33 = vadd.f32 %v1386_v35, %v1298_v54  ;;  %v905_v6 = vadd.f32 %v3760_v45, %v835_v37  ;;  %v906_v8 = vadd.f32 %v3762_v46, %v836_v39  ;;  %v669_v54 = vpop.permute.xlu0 %668  ;;  %v576_v37 = vmul.f32 %v3728_v24, %v447_v1 }
 0x141   : > { %v775_v27 = vmul.f32 %v3730_v25, %v669_v54 }
 0x142   : > { %v1635_v14 = vmax.f32 %v1387_v33, 0.0  ;;  %1269 = vmatmul.bf16.gmra.mxu0 %v4218_v0  ;;  %1437 = vmatmul.bf16.gmra.mxu2 %v4125_v40  ;;  %v2978_v40 = vld [vmem:[%s4877_s5 + $0x40] sm:$0xf]  ;;  %v969_v2 = vmax.f32 %v905_v6, 0.0  ;;  %v970_v28 = vmax.f32 %v906_v8, 0.0  ;;  %v3043_v33 = vor.u32 %v3198_v19, %v3042_v13 }
 0x143   : > { %1358 = vmatmul.bf16.gmra.mxu1 %v4222_v21  ;;  %1526 = vmatmul.bf16.gmra.mxu3 %v4129_v61  ;;  %v3199_v61 = vld [vmem:[%s4877_s5 + $0xd4] sm:$0xf]  ;;  %v2979_v62 = vor.u32 %v3182_v44, %v2978_v40  ;;  %v773_v40 = vmul.f32 %v3730_v25, %v665_v32  ;;  %v776_v44 = vmul.f32 %v3732_v26, %v669_v54  ;;  %v3180_v8 = vld [vmem:[%s4877_s5 + $0x34] sm:$0xf0] }
 0x144   : > { %v4248_v49 = vpack.c.bf16 %v1635_v14, %v1633_v34  ;;  %v3055_v42 = vor.u32 %v3199_v61, %v3052_v47  ;;  %1983 = vmatpush.bf16.msrb.mxu1 %v3043_v33  ;;  %v4265_v9 = vpack.c.bf16 %v969_v2, %v967_v18  ;;  %v4269_v43 = vpack.c.bf16 %v970_v28, %v968_v20 }
 0x145   : > { %v1300_v55 = vpop.f32.mrf.mxu2  ;;  %v1389_v36 = vpop.f32.mrf.mxu3  ;;  %1894 = vmatpush.bf16.msrb.mxu0 %v2979_v62  ;;  %v774_v47 = vmul.f32 %v3732_v26, %v665_v32 }
 0x146   : > { %v1301_v3 = vadd.f32 %v1300_v55, %v4142_v59  ;;  %v452_v35 = vpop.permute.xlu1 %451  ;;  %2160 = vmatpush.bf16.msra.mxu3 %v3055_v42 }
 0x147   : > { %v577_v41 = vmul.f32 %v3726_v23, %v452_v35  ;;  %v578_v61 = vmul.f32 %v3728_v24, %v452_v35  ;;  %v838_v6 = vadd.f32 %v774_v47, %v576_v37  ;;  %v2971_v35 = vor.u32 %v3180_v8, %v2970_v38 }
 0x148   : > { %v1390_v4 = vadd.f32 %v1389_v36, %v1301_v3  ;;  %v837_v3 = vadd.f32 %v773_v40, %v575_v56  ;;  %v673_v33 = vpop.permute.xlu0 %672 }
 0x149   : > { %v839_v42 = vadd.f32 %v775_v27, %v577_v41  ;;  %v840_v5 = vadd.f32 %v776_v44, %v578_v61  ;;  %1895 = vmatpush.bf16.msrb.mxu0 %v2971_v35  ;;  %v908_v13 = vadd.f32 %v3762_v46, %v838_v6  ;;  %v777_v47 = vmul.f32 %v3730_v25, %v673_v33 }
 0x14a   : > { %v1637_v36 = vmax.f32 %v1390_v4, 0.0  ;;  %v907_v54 = vadd.f32 %v3760_v45, %v837_v3 }
 0x14b   : > { %v910_v19 = vadd.f32 %v3762_v46, %v840_v5  ;;  %v972_v56 = vmax.f32 %v908_v13, 0.0  ;;  %v2980_v13 = vld [vmem:[%s4877_s5 + $0x48] sm:$0xf0] }
 0x14c   : > { %v971_v28 = vmax.f32 %v907_v54, 0.0 }
 0x14d   : > { %v1302_v34 = vpop.f32.mrf.mxu2  ;;  %v1391_v14 = vpop.f32.mrf.mxu3  ;;  %v974_v37 = vmax.f32 %v910_v19, 0.0 }
 0x14e   : > { %v1303_v39 = vadd.f32 %v1302_v34, %v4142_v59  ;;  %v457_v55 = vpop.permute.xlu1 %456  ;;  %v3034_v34 = vld [vmem:[%s4877_s5 + $0xb0] sm:$0xf] }
 0x14f   : > { %v579_v61 = vmul.f32 %v3726_v23, %v457_v55  ;;  %v580_v5 = vmul.f32 %v3728_v24, %v457_v55  ;;  %v4306_v6 = vpack.c.bf16 %v974_v37, %v972_v56 }
 0x150   : > { %v1392_v1 = vadd.f32 %v1391_v14, %v1303_v39  ;;  %v3196_v14 = vld [vmem:[%s4877_s5 + $0xb4] sm:$0xf0]  ;;  %v462_v39 = vpop.permute.xlu2 %461 }
 0x151   : > { %v3035_v41 = vor.u32 %v3196_v14, %v3034_v34  ;;  %v581_v3 = vmul.f32 %v3726_v23, %v462_v39  ;;  %v582_v8 = vmul.f32 %v3728_v24, %v462_v39  ;;  %v2954_v34 = vld [vmem:[%s4877_s5 + $0x10] sm:$0xf]  ;;  %v3176_v14 = vld [vmem:[%s4877_s5 + $0x14] sm:$0xf0] }
 0x152   : > { %v1639_v62 = vmax.f32 %v1392_v1, 0.0  ;;  %1274 = vmatmul.bf16.gmra.mxu0 %v4265_v9  ;;  %1442 = vmatmul.bf16.gmra.mxu2 %v4181_v15  ;;  %v778_v1 = vmul.f32 %v3732_v26, %v673_v33  ;;  %v2955_v39 = vor.u32 %v3176_v14, %v2954_v34 }
 0x153   : > { %1363 = vmatmul.bf16.gmra.mxu1 %v4269_v43  ;;  %1531 = vmatmul.bf16.gmra.mxu3 %v4185_v48  ;;  %v909_v48 = vadd.f32 %v3760_v45, %v839_v42 }
 0x154   : > { %v4284_v4 = vpack.c.bf16 %v1639_v62, %v1637_v36  ;;  %1984 = vmatpush.bf16.msrb.mxu1 %v3035_v41  ;;  %v842_v24 = vadd.f32 %v778_v1, %v580_v5 }
 0x155   : > { %v1305_v15 = vpop.f32.mrf.mxu2  ;;  %v1394_v18 = vpop.f32.mrf.mxu3  ;;  %v973_v32 = vmax.f32 %v909_v48, 0.0  ;;  %v3181_v48 = vld [vmem:[%s4877_s5 + $0x44] sm:$0xf] }
 0x156   : > { %v1306_v2 = vadd.f32 %v1305_v15, %v4142_v59  ;;  %v677_v27 = vpop.permute.xlu1 %676  ;;  %v841_v15 = vadd.f32 %v777_v47, %v579_v61  ;;  %v2983_v19 = vor.u32 %v3181_v48, %v2980_v13  ;;  %v912_v41 = vadd.f32 %v3762_v46, %v842_v24  ;;  %v2946_v61 = vld [vmem:[%s4877_s5] sm:$0xf]  ;;  %v3174_v47 = vld [vmem:[%s4877_s5 + $0x4] sm:$0xf0] }
 0x157   : > { %v4301_v62 = vpack.c.bf16 %v973_v32, %v971_v28  ;;  %v779_v42 = vmul.f32 %v3730_v25, %v677_v27  ;;  %v780_v38 = vmul.f32 %v3732_v26, %v677_v27  ;;  %v3178_v25 = vld [vmem:[%s4877_s5 + $0x24] sm:$0xf0] }
 0x158   : > { %v1395_v20 = vadd.f32 %v1394_v18, %v1306_v2  ;;  %v2962_v18 = vld [vmem:[%s4877_s5 + $0x20] sm:$0xf]  ;;  %v911_v37 = vadd.f32 %v3760_v45, %v841_v15  ;;  %2072 = vmatpush.bf16.msra.mxu2 %v2983_v19  ;;  %v3192_v19 = vld [vmem:[%s4877_s5 + $0x94] sm:$0xf0] }
 0x159   : > { %v843_v55 = vadd.f32 %v779_v42, %v581_v3  ;;  %v2963_v26 = vor.u32 %v3178_v25, %v2962_v18  ;;  %v844_v54 = vadd.f32 %v780_v38, %v582_v8  ;;  %v2947_v42 = vor.u32 %v3174_v47, %v2946_v61 }
 0x15a   : > { %v1641_v2 = vmax.f32 %v1395_v20, 0.0  ;;  %v975_v1 = vmax.f32 %v911_v37, 0.0  ;;  %v976_v3 = vmax.f32 %v912_v41, 0.0  ;;  %v2972_v41 = vld [vmem:[%s4877_s5 + $0x38] sm:$0xf0] }
 0x15b   : > { %1896 = vmatpush.bf16.msrb.mxu0 %v2963_v26  ;;  %v913_v27 = vadd.f32 %v3760_v45, %v843_v55  ;;  %v3026_v45 = vld [vmem:[%s4877_s5 + $0xa0] sm:$0xf] }
 0x15d   : > { %v1307_v40 = vpop.f32.mrf.mxu2  ;;  %v1396_v44 = vpop.f32.mrf.mxu3 }
 0x15e   : > { %v1308_v36 = vadd.f32 %v1307_v40, %v4142_v59  ;;  %v914_v40 = vadd.f32 %v3762_v46, %v844_v54  ;;  %v3194_v46 = vld [vmem:[%s4877_s5 + $0xa4] sm:$0xf0] }
 0x15f   : > { %1897 = vmatpush.bf16.msrb.mxu0 %v2955_v39  ;;  %v3027_v38 = vor.u32 %v3194_v46, %v3026_v45  ;;  %v3179_v39 = vld [vmem:[%s4877_s5 + $0x34] sm:$0xf] }
 0x160   : > { %v1397_v35 = vadd.f32 %v1396_v44, %v1308_v36  ;;  %v977_v36 = vmax.f32 %v913_v27, 0.0  ;;  %v978_v5 = vmax.f32 %v914_v40, 0.0  ;;  %v3195_v40 = vld [vmem:[%s4877_s5 + $0xb4] sm:$0xf] }
 0x161   : > { %1985 = vmatpush.bf16.msrb.mxu1 %v3027_v38 }
 0x162   : > { %v1643_v23 = vmax.f32 %v1397_v35, 0.0  ;;  %1279 = vmatmul.bf16.gmra.mxu0 %v4301_v62  ;;  %1447 = vmatmul.bf16.gmra.mxu2 %v4218_v0  ;;  %v3197_v0 = vld [vmem:[%s4877_s5 + $0xc4] sm:$0xf]  ;;  %v4358_v18 = vpack.c.bf16 %v977_v36, %v975_v1  ;;  %v4360_v25 = vpack.c.bf16 %v978_v5, %v976_v3 }
 0x163   : > { %1368 = vmatmul.bf16.gmra.mxu1 %v4306_v6  ;;  %1536 = vmatmul.bf16.gmra.mxu3 %v4222_v21  ;;  %v3044_v21 = vld [vmem:[%s4877_s5 + $0xc8] sm:$0xf0] }
 0x164   : > { %v4332_v20 = vpack.c.bf16 %v1643_v23, %v1641_v2  ;;  %v3047_v33 = vor.u32 %v3197_v0, %v3044_v21  ;;  %1898 = vmatpush.bf16.msrb.mxu0 %v2947_v42  ;;  %v3018_v0 = vld [vmem:[%s4877_s5 + $0x90] sm:$0xf] }
 0x165   : > { %v1310_v28 = vpop.f32.mrf.mxu2  ;;  %v1399_v32 = vpop.f32.mrf.mxu3 }
 0x166   : > { %v1311_v56 = vadd.f32 %v1310_v28, %v4142_v59  ;;  %2161 = vmatpush.bf16.msra.mxu3 %v3047_v33 }
 0x168   : > { %v1400_v44 = vadd.f32 %v1399_v32, %v1311_v56 }
 0x16a   : > { %v1645_v23 = vmax.f32 %v1400_v44, 0.0 }
 0x16d   : > { %v1312_v8 = vpop.f32.mrf.mxu2  ;;  %v1401_v35 = vpop.f32.mrf.mxu3 }
 0x16e   : > { %v1313_v15 = vadd.f32 %v1312_v8, %v4142_v59 }
 0x170   : > { %v1402_v2 = vadd.f32 %v1401_v35, %v1313_v15  ;;  %v3010_v35 = vld [vmem:[%s4877_s5 + $0x80] sm:$0xf]  ;;  %v3190_v15 = vld [vmem:[%s4877_s5 + $0x84] sm:$0xf0] }
 0x172   : > { %v1647_v55 = vmax.f32 %v1402_v2, 0.0  ;;  %1284 = vmatmul.bf16.gmra.mxu0 %v4358_v18  ;;  %1452 = vmatmul.bf16.gmra.mxu2 %v4265_v9  ;;  %v3019_v9 = vor.u32 %v3192_v19, %v3018_v0  ;;  %v3011_v2 = vor.u32 %v3190_v15, %v3010_v35 }
 0x173   : > { %1373 = vmatmul.bf16.gmra.mxu1 %v4360_v25  ;;  %1541 = vmatmul.bf16.gmra.mxu3 %v4269_v43 }
 0x174   : > { %v4366_v26 = vpack.c.bf16 %v1647_v55, %v1645_v23  ;;  %1986 = vmatpush.bf16.msrb.mxu1 %v3019_v9 }
 0x175   : > { %v1315_v24 = vpop.f32.mrf.mxu2  ;;  %v1404_v54 = vpop.f32.mrf.mxu3 }
 0x176   : > { %v1316_v48 = vadd.f32 %v1315_v24, %v4142_v59 }
 0x178   : > { %v1405_v13 = vadd.f32 %v1404_v54, %v1316_v48  ;;  %1987 = vmatpush.bf16.msrb.mxu1 %v3011_v2  ;;  %v3193_v2 = vld [vmem:[%s4877_s5 + $0xa4] sm:$0xf] }
 0x17a   : > { %v1649_v56 = vmax.f32 %v1405_v13, 0.0 }
 0x17d   : > { %v1250_v21 = vpop.f32.mrf.mxu0  ;;  %v1317_v28 = vpop.f32.mrf.mxu2 }
 0x17e   : > { %v1318_v43 = vadd.f32 %v1317_v28, %v4142_v59  ;;  %v1406_v32 = vpop.f32.mrf.mxu3  ;;  %v1339_v33 = vpop.f32.mrf.mxu1  ;;  %v1251_v34 = vadd.f32 %v1250_v21, %v4142_v59  ;;  %v3212_v28 = vld [vmem:[#allocation2 + $0x38] sm:$0xff] }
 0x17f   : > { %2475 = vmatpush.bf16.msra.mxu0 %v3212_v28 }
 0x180   : > { %v1407_v14 = vadd.f32 %v1406_v32, %v1318_v43  ;;  %v1340_v27 = vadd.f32 %v1339_v33, %v1251_v34 }
 0x182   : > { %v1651_v37 = vmax.f32 %v1407_v14, 0.0  ;;  %1457 = vmatmul.bf16.gmra.mxu2 %v4301_v62  ;;  %v2975_v62 = vor.u32 %v3179_v39, %v2972_v41  ;;  %v1597_v3 = vmax.f32 %v1340_v27, 0.0 }
 0x183   : > { %1546 = vmatmul.bf16.gmra.mxu3 %v4306_v6  ;;  %v3036_v6 = vld [vmem:[%s4877_s5 + $0xb8] sm:$0xf0] }
 0x184   : > { %v4388_v44 = vpack.c.bf16 %v1651_v37, %v1649_v56  ;;  %v3039_v42 = vor.u32 %v3195_v40, %v3036_v6  ;;  %2073 = vmatpush.bf16.msra.mxu2 %v2975_v62 }
 0x185   : > { %v1252_v61 = vpop.f32.mrf.mxu0  ;;  %v1320_v47 = vpop.f32.mrf.mxu2 }
 0x186   : > { %v1253_v1 = vadd.f32 %v1252_v61, %v4142_v59  ;;  %v1321_v36 = vadd.f32 %v1320_v47, %v4142_v59  ;;  %v1409_v45 = vpop.f32.mrf.mxu3  ;;  %v1341_v46 = vpop.f32.mrf.mxu1  ;;  %2162 = vmatpush.bf16.msra.mxu3 %v3039_v42  ;;  %v3220_v61 = vld [vmem:[#allocation2 + $0x78] sm:$0xff] }
 0x187   : > { %2564 = vmatpush.bf16.msra.mxu1 %v3220_v61 }
 0x188   : > { %v1410_v5 = vadd.f32 %v1409_v45, %v1321_v36  ;;  %v1342_v38 = vadd.f32 %v1341_v46, %v1253_v1 }
 0x18a   : > { %v1599_v8 = vmax.f32 %v1342_v38, 0.0  ;;  %v1653_v19 = vmax.f32 %v1410_v5, 0.0  ;;  %v3177_v5 = vld [vmem:[%s4877_s5 + $0x24] sm:$0xf]  ;;  %v2964_v38 = vld [vmem:[%s4877_s5 + $0x28] sm:$0xf0] }
 0x18b   : > { %v2967_v15 = vor.u32 %v3177_v5, %v2964_v38 }
 0x18c   : > { %v4401_v23 = vpack.c.bf16 %v1599_v8, %v1597_v3 }
 0x18d   : > { %v1322_v55 = vpop.f32.mrf.mxu2  ;;  %2074 = vmatpush.bf16.msra.mxu2 %v2967_v15 }
 0x18e   : > { %v1323_v24 = vadd.f32 %v1322_v55, %v4142_v59  ;;  %v1411_v54 = vpop.f32.mrf.mxu3  ;;  %1899 = vmatmul.bf16.vlgmr.msrb.gmra.mxu0 %v4401_v23  ;;  %v4434_v55 = vperm.slane %v4134_v22, 1 }
 0x18f   : > { %v1255_v48 = vpop.f32.mrf.mxu0 }
 0x190   : > { %v1412_v13 = vadd.f32 %v1411_v54, %v1323_v24  ;;  %v1344_v0 = vpop.f32.mrf.mxu1  ;;  %v1256_v21 = vadd.f32 %v1255_v48, %v4142_v59 }
 0x192   : > { %v1655_v9 = vmax.f32 %v1412_v13, 0.0  ;;  %1462 = vmatmul.bf16.gmra.mxu2 %v4358_v18  ;;  %v1345_v33 = vadd.f32 %v1344_v0, %v1256_v21 }
 0x193   : > { %1551 = vmatmul.bf16.gmra.mxu3 %v4360_v25 }
 0x194   : > { %v4408_v43 = vpack.c.bf16 %v1655_v9, %v1653_v19  ;;  %v1601_v41 = vmax.f32 %v1345_v33, 0.0 }
 0x195   : > { %v1325_v32 = vpop.f32.mrf.mxu2 }
 0x196   : > { %v1326_v34 = vadd.f32 %v1325_v32, %v4142_v59  ;;  %v1414_v14 = vpop.f32.mrf.mxu3 }
 0x197   : > { %v1257_v56 = vpop.f32.mrf.mxu0 }
 0x198   : > { %v1415_v37 = vadd.f32 %v1414_v14, %v1326_v34  ;;  %v1258_v27 = vadd.f32 %v1257_v56, %v4142_v59  ;;  %v1346_v39 = vpop.f32.mrf.mxu1 }
 0x19a   : > { %v1347_v40 = vadd.f32 %v1346_v39, %v1258_v27  ;;  %v1657_v46 = vmax.f32 %v1415_v37, 0.0 }
 0x19c   : > { %v1603_v18 = vmax.f32 %v1347_v40, 0.0 }
 0x19d   : > { %v1327_v25 = vpop.f32.mrf.mxu2 }
 0x19e   : > { %v1328_v47 = vadd.f32 %v1327_v25, %v4142_v59  ;;  %v1416_v62 = vpop.f32.mrf.mxu3  ;;  %v4413_v6 = vpack.c.bf16 %v1603_v18, %v1601_v41  ;;  %v3211_v18 = vld [vmem:[#allocation2 + $0x30] sm:$0xff] }
 0x19f   : > { %v1260_v1 = vpop.f32.mrf.mxu0  ;;  %2476 = vmatpush.bf16.msra.mxu0 %v3211_v18 }
 0x1a0   : > { %v1417_v36 = vadd.f32 %v1416_v62, %v1328_v47  ;;  %v1349_v45 = vpop.f32.mrf.mxu1  ;;  %1904 = vmatmul.bf16.gmra.mxu0 %v4413_v6  ;;  %v1261_v3 = vadd.f32 %v1260_v1, %v4142_v59 }
 0x1a2   : > { %v1659_v42 = vmax.f32 %v1417_v36, 0.0  ;;  %1467 = vmatmul.bf16.gmra.mxu2 %v3783_v10  ;;  %v3028_v10 = vld [vmem:[%s4877_s5 + $0xa8] sm:$0xf0] }
 0x1a3   : > { %1556 = vmatmul.bf16.gmra.mxu3 %v3785_v11  ;;  %v1350_v11 = vadd.f32 %v1349_v45, %v1261_v3  ;;  %v3031_v54 = vor.u32 %v3193_v2, %v3028_v10 }
 0x1a4   : > { %v4425_v8 = vpack.c.bf16 %v1659_v42, %v1657_v46  ;;  %v3219_v42 = vld [vmem:[#allocation2 + $0x70] sm:$0xff] }
 0x1a5   : > { %v1428_v35 = vpop.f32.mrf.mxu2  ;;  %2163 = vmatpush.bf16.msra.mxu3 %v3031_v54  ;;  %v1605_v19 = vmax.f32 %v1350_v11, 0.0  ;;  %2565 = vmatpush.bf16.msra.mxu1 %v3219_v42 }
 0x1a6   : > { %v1517_v24 = vpop.f32.mrf.mxu3  ;;  %v1429_v9 = vadd.f32 %v1428_v35, %v4434_v55 }
 0x1a7   : > { %v1262_v48 = vpop.f32.mrf.mxu0 }
 0x1a8   : > { %v1263_v13 = vadd.f32 %v1262_v48, %v4142_v59  ;;  %v1351_v0 = vpop.f32.mrf.mxu1  ;;  %v1518_v33 = vadd.f32 %v1517_v24, %v1429_v9  ;;  %v2956_v9 = vld [vmem:[%s4877_s5 + $0x18] sm:$0xf0] }
 0x1aa   : > { %v1352_v21 = vadd.f32 %v1351_v0, %v1263_v13  ;;  %v1598_v39 = vmax.f32 %v1518_v33, 0.0 }
 0x1ac   : > { %v1607_v28 = vmax.f32 %v1352_v21, 0.0 }
 0x1ad   : > { %v1430_v32 = vpop.f32.mrf.mxu2 }
 0x1ae   : > { %v1431_v34 = vadd.f32 %v1430_v32, %v4434_v55  ;;  %v1519_v14 = vpop.f32.mrf.mxu3  ;;  %v4439_v22 = vpack.c.bf16 %v1607_v28, %v1605_v19  ;;  %v3175_v19 = vld [vmem:[%s4877_s5 + $0x14] sm:$0xf] }
 0x1af   : > { %v1265_v56 = vpop.f32.mrf.mxu0  ;;  %v2959_v28 = vor.u32 %v3175_v19, %v2956_v9  ;;  %v3191_v32 = vld [vmem:[%s4877_s5 + $0x94] sm:$0xf] }
 0x1b0   : > { %v1520_v37 = vadd.f32 %v1519_v14, %v1431_v34  ;;  %v1354_v27 = vpop.f32.mrf.mxu1  ;;  %1909 = vmatmul.bf16.gmra.mxu0 %v4439_v22  ;;  %v1266_v40 = vadd.f32 %v1265_v56, %v4142_v59 }
 0x1b1   : > { %2075 = vmatpush.bf16.msra.mxu2 %v2959_v28 }
 0x1b2   : > { %v1600_v41 = vmax.f32 %v1520_v37, 0.0  ;;  %1472 = vmatmul.bf16.gmra.mxu2 %v3826_v52  ;;  %v1355_v1 = vadd.f32 %v1354_v27, %v1266_v40 }
 0x1b3   : > { %1561 = vmatmul.bf16.gmra.mxu3 %v3828_v53 }
 0x1b4   : > { %v4445_v61 = vpack.c.bf16 %v1600_v41, %v1598_v39  ;;  %v1609_v53 = vmax.f32 %v1355_v1, 0.0 }
 0x1b5   : > { %v1433_v25 = vpop.f32.mrf.mxu2 }
 0x1b6   : > { %v1522_v47 = vpop.f32.mrf.mxu3  ;;  %1988 = vmatmul.bf16.vlgmr.msrb.gmra.mxu1 %v4445_v61  ;;  %v1434_v46 = vadd.f32 %v1433_v25, %v4434_v55 }
 0x1b7   : > { %v1267_v62 = vpop.f32.mrf.mxu0 }
 0x1b8   : > { %v1268_v36 = vadd.f32 %v1267_v62, %v4142_v59  ;;  %v1356_v45 = vpop.f32.mrf.mxu1  ;;  %v1523_v38 = vadd.f32 %v1522_v47, %v1434_v46 }
 0x1ba   : > { %v1357_v52 = vadd.f32 %v1356_v45, %v1268_v36  ;;  %v1602_v54 = vmax.f32 %v1523_v38, 0.0 }
 0x1bc   : > { %v1611_v3 = vmax.f32 %v1357_v52, 0.0 }
 0x1bd   : > { %v1435_v5 = vpop.f32.mrf.mxu2 }
 0x1be   : > { %v1436_v35 = vadd.f32 %v1435_v5, %v4434_v55  ;;  %v1524_v15 = vpop.f32.mrf.mxu3  ;;  %v4451_v2 = vpack.c.bf16 %v1611_v3, %v1609_v53  ;;  %v3210_v5 = vld [vmem:[#allocation2 + $0x28] sm:$0xff] }
 0x1bf   : > { %v1270_v10 = vpop.f32.mrf.mxu0  ;;  %2477 = vmatpush.bf16.msra.mxu0 %v3210_v5 }
 0x1c0   : > { %v1525_v11 = vadd.f32 %v1524_v15, %v1436_v35  ;;  %v1359_v24 = vpop.f32.mrf.mxu1  ;;  %1914 = vmatmul.bf16.gmra.mxu0 %v4451_v2  ;;  %v1271_v13 = vadd.f32 %v1270_v10, %v4142_v59 }
 0x1c2   : > { %v1604_v48 = vmax.f32 %v1525_v11, 0.0  ;;  %1477 = vmatmul.bf16.gmra.mxu2 %v3867_v31  ;;  %v3020_v31 = vld [vmem:[%s4877_s5 + $0x98] sm:$0xf0] }
 0x1c3   : > { %1566 = vmatmul.bf16.gmra.mxu3 %v3869_v29  ;;  %v1360_v29 = vadd.f32 %v1359_v24, %v1271_v13  ;;  %v3023_v34 = vor.u32 %v3191_v32, %v3020_v31 }
 0x1c4   : > { %v4457_v0 = vpack.c.bf16 %v1604_v48, %v1602_v54 }
 0x1c5   : > { %v1438_v21 = vpop.f32.mrf.mxu2  ;;  %2164 = vmatpush.bf16.msra.mxu3 %v3023_v34  ;;  %v1613_v27 = vmax.f32 %v1360_v29, 0.0 }
 0x1c6   : > { %v1527_v33 = vpop.f32.mrf.mxu3  ;;  %1993 = vmatmul.bf16.gmra.mxu1 %v4457_v0  ;;  %v1439_v39 = vadd.f32 %v1438_v21, %v4434_v55 }
 0x1c7   : > { %v1272_v14 = vpop.f32.mrf.mxu0 }
 0x1c8   : > { %v1273_v56 = vadd.f32 %v1272_v14, %v4142_v59  ;;  %v1361_v37 = vpop.f32.mrf.mxu1  ;;  %v1528_v25 = vadd.f32 %v1527_v33, %v1439_v39  ;;  %v3189_v39 = vld [vmem:[%s4877_s5 + $0x84] sm:$0xf] }
 0x1ca   : > { %v1362_v41 = vadd.f32 %v1361_v37, %v1273_v56  ;;  %v1606_v52 = vmax.f32 %v1528_v25, 0.0  ;;  %v3173_v37 = vld [vmem:[%s4877_s5 + $0x4] sm:$0xf] }
 0x1cc   : > { %v1615_v40 = vmax.f32 %v1362_v41, 0.0 }
 0x1cd   : > { %v1440_v18 = vpop.f32.mrf.mxu2 }
 0x1ce   : > { %v1441_v47 = vadd.f32 %v1440_v18, %v4434_v55  ;;  %v1529_v62 = vpop.f32.mrf.mxu3  ;;  %v4475_v1 = vpack.c.bf16 %v1615_v40, %v1613_v27  ;;  %v2948_v27 = vld [vmem:[%s4877_s5 + $0x8] sm:$0xf0] }
 0x1cf   : > { %v1275_v36 = vpop.f32.mrf.mxu0  ;;  %v2951_v40 = vor.u32 %v3173_v37, %v2948_v27 }
 0x1d0   : > { %v1530_v45 = vadd.f32 %v1529_v62, %v1441_v47  ;;  %v1364_v46 = vpop.f32.mrf.mxu1  ;;  %1919 = vmatmul.bf16.gmra.mxu0 %v4475_v1  ;;  %v1276_v53 = vadd.f32 %v1275_v36, %v4142_v59 }
 0x1d1   : > { %2076 = vmatpush.bf16.msra.mxu2 %v2951_v40 }
 0x1d2   : > { %v1608_v42 = vmax.f32 %v1530_v45, 0.0  ;;  %1482 = vmatmul.bf16.gmra.mxu2 %v3914_v16  ;;  %v1365_v35 = vadd.f32 %v1364_v46, %v1276_v53  ;;  %v3218_v16 = vld [vmem:[#allocation2 + $0x68] sm:$0xff] }
 0x1d3   : > { %1571 = vmatmul.bf16.gmra.mxu3 %v3916_v30  ;;  %2566 = vmatpush.bf16.msra.mxu1 %v3218_v16 }
 0x1d4   : > { %v4481_v3 = vpack.c.bf16 %v1608_v42, %v1606_v52  ;;  %v1617_v54 = vmax.f32 %v1365_v35, 0.0 }
 0x1d5   : > { %v1443_v38 = vpop.f32.mrf.mxu2 }
 0x1d6   : > { %v1532_v15 = vpop.f32.mrf.mxu3  ;;  %1998 = vmatmul.bf16.gmra.mxu1 %v4481_v3  ;;  %v1444_v48 = vadd.f32 %v1443_v38, %v4434_v55 }
 0x1d7   : > { %v1277_v10 = vpop.f32.mrf.mxu0 }
 0x1d8   : > { %v1278_v11 = vadd.f32 %v1277_v10, %v4142_v59  ;;  %v1366_v24 = vpop.f32.mrf.mxu1  ;;  %v1533_v9 = vadd.f32 %v1532_v15, %v1444_v48 }
 0x1da   : > { %v1367_v13 = vadd.f32 %v1366_v24, %v1278_v11  ;;  %v1610_v34 = vmax.f32 %v1533_v9, 0.0 }
 0x1dc   : > { %v1619_v19 = vmax.f32 %v1367_v13, 0.0 }
 0x1dd   : > { %v1445_v30 = vpop.f32.mrf.mxu2 }
 0x1de   : > { %v1446_v21 = vadd.f32 %v1445_v30, %v4434_v55  ;;  %v1534_v28 = vpop.f32.mrf.mxu3  ;;  %v4487_v32 = vpack.c.bf16 %v1619_v19, %v1617_v54  ;;  %v3209_v30 = vld [vmem:[#allocation2 + $0x20] sm:$0xff] }
 0x1df   : > { %v1280_v31 = vpop.f32.mrf.mxu0  ;;  %2478 = vmatpush.bf16.msra.mxu0 %v3209_v30 }
 0x1e0   : > { %v1535_v29 = vadd.f32 %v1534_v28, %v1446_v21  ;;  %v1369_v33 = vpop.f32.mrf.mxu1  ;;  %1924 = vmatmul.bf16.gmra.mxu0 %v4487_v32  ;;  %v1281_v56 = vadd.f32 %v1280_v31, %v4142_v59 }
 0x1e2   : > { %v1612_v14 = vmax.f32 %v1535_v29, 0.0  ;;  %1487 = vmatmul.bf16.gmra.mxu2 %v3953_v17  ;;  %v3012_v17 = vld [vmem:[%s4877_s5 + $0x88] sm:$0xf0]  ;;  %v1370_v25 = vadd.f32 %v1369_v33, %v1281_v56 }
 0x1e3   : > { %1576 = vmatmul.bf16.gmra.mxu3 %v3955_v63  ;;  %v3015_v18 = vor.u32 %v3189_v39, %v3012_v17 }
 0x1e4   : > { %v4502_v41 = vpack.c.bf16 %v1612_v14, %v1610_v34  ;;  %v1621_v46 = vmax.f32 %v1370_v25, 0.0  ;;  %v3217_v14 = vld [vmem:[#allocation2 + $0x60] sm:$0xff] }
 0x1e5   : > { %v1448_v63 = vpop.f32.mrf.mxu2  ;;  %2165 = vmatpush.bf16.msra.mxu3 %v3015_v18  ;;  %2567 = vmatpush.bf16.msra.mxu1 %v3217_v14  ;;  %v4551_v14 = vld [vmem:[%s4878_s6] sm:$0x3] }
 0x1e6   : > { %v1537_v47 = vpop.f32.mrf.mxu3  ;;  %2003 = vmatmul.bf16.gmra.mxu1 %v4502_v41  ;;  %v1449_v52 = vadd.f32 %v1448_v63, %v4434_v55 }
 0x1e7   : > { %v1282_v62 = vpop.f32.mrf.mxu0 }
 0x1e8   : > { %v1283_v36 = vadd.f32 %v1282_v62, %v4142_v59  ;;  %v1371_v45 = vpop.f32.mrf.mxu1  ;;  %v1538_v38 = vadd.f32 %v1537_v47, %v1449_v52 }
 0x1ea   : > { %v1372_v42 = vadd.f32 %v1371_v45, %v1283_v36  ;;  %v1614_v48 = vmax.f32 %v1538_v38, 0.0 }
 0x1ec   : > { %v1623_v53 = vmax.f32 %v1372_v42, 0.0 }
 0x1ed   : > { %v1450_v5 = vpop.f32.mrf.mxu2 }
 0x1ee   : > { %v1451_v35 = vadd.f32 %v1450_v5, %v4434_v55  ;;  %v1539_v15 = vpop.f32.mrf.mxu3  ;;  %v4511_v10 = vpack.c.bf16 %v1623_v53, %v1621_v46 }
 0x1ef   : > { %v1285_v11 = vpop.f32.mrf.mxu0 }
 0x1f0   : > { %v1540_v24 = vadd.f32 %v1539_v15, %v1451_v35  ;;  %v1374_v54 = vpop.f32.mrf.mxu1  ;;  %1929 = vmatmul.bf16.gmra.mxu0 %v4511_v10  ;;  %v1286_v16 = vadd.f32 %v1285_v11, %v4142_v59 }
 0x1f2   : > { %v1616_v13 = vmax.f32 %v1540_v24, 0.0  ;;  %1492 = vmatmul.bf16.gmra.mxu2 %v4002_v50  ;;  %v1375_v31 = vadd.f32 %v1374_v54, %v1286_v16  ;;  %v3208_v24 = vld [vmem:[#allocation2 + $0x18] sm:$0xff] }
 0x1f3   : > { %1581 = vmatmul.bf16.gmra.mxu3 %v4004_v51  ;;  %2479 = vmatpush.bf16.msra.mxu0 %v3208_v24 }
 0x1f4   : > { %v4517_v19 = vpack.c.bf16 %v1616_v13, %v1614_v48  ;;  %v1625_v51 = vmax.f32 %v1375_v31, 0.0  ;;  %v3216_v48 = vld [vmem:[#allocation2 + $0x58] sm:$0xff] }
 0x1f5   : > { %v1453_v9 = vpop.f32.mrf.mxu2  ;;  %2568 = vmatpush.bf16.msra.mxu1 %v3216_v48 }
 0x1f6   : > { %v1542_v21 = vpop.f32.mrf.mxu3  ;;  %2008 = vmatmul.bf16.gmra.mxu1 %v4517_v19  ;;  %v1454_v34 = vadd.f32 %v1453_v9, %v4434_v55 }
 0x1f7   : > { %v1287_v28 = vpop.f32.mrf.mxu0 }
 0x1f8   : > { %v1288_v29 = vadd.f32 %v1287_v28, %v4142_v59  ;;  %v1376_v33 = vpop.f32.mrf.mxu1  ;;  %v1543_v27 = vadd.f32 %v1542_v21, %v1454_v34 }
 0x1fa   : > { %v1377_v50 = vadd.f32 %v1376_v33, %v1288_v29  ;;  %v1618_v18 = vmax.f32 %v1543_v27, 0.0 }
 0x1fc   : > { %v1627_v56 = vmax.f32 %v1377_v50, 0.0 }
 0x1fd   : > { %v1455_v37 = vpop.f32.mrf.mxu2 }
 0x1fe   : > { %v1456_v39 = vadd.f32 %v1455_v37, %v4434_v55  ;;  %v1544_v40 = vpop.f32.mrf.mxu3  ;;  %v4523_v17 = vpack.c.bf16 %v1627_v56, %v1625_v51 }
 0x200   : > { %v1545_v63 = vadd.f32 %v1544_v40, %v1456_v39  ;;  %1934 = vmatmul.bf16.gmra.mxu0 %v4523_v17 }
 0x202   : > { %v1620_v59 = vmax.f32 %v1545_v63, 0.0  ;;  %1497 = vmatmul.bf16.gmra.mxu2 %v4044_v57 }
 0x203   : > { %1586 = vmatmul.bf16.gmra.mxu3 %v4046_v60 }
 0x204   : > { %v4528_v25 = vpack.c.bf16 %v1620_v59, %v1618_v18 }
 0x205   : > { %v1458_v47 = vpop.f32.mrf.mxu2 }
 0x206   : > { %v1547_v62 = vpop.f32.mrf.mxu3  ;;  %2013 = vmatmul.bf16.gmra.mxu1 %v4528_v25  ;;  %v1459_v36 = vadd.f32 %v1458_v47, %v4434_v55 }
 0x208   : > { %v1548_v52 = vadd.f32 %v1547_v62, %v1459_v36 }
 0x20a   : > { %v1622_v57 = vmax.f32 %v1548_v52, 0.0 }
 0x20b   : > { %v1900_v45 = vpop.f32.mrf.mxu0 }
 0x20d   : > { %v1460_v46 = vpop.f32.mrf.mxu2 }
 0x20e   : > { %v1461_v42 = vadd.f32 %v1460_v46, %v4434_v55  ;;  %v1549_v53 = vpop.f32.mrf.mxu3 }
 0x210   : > { %v1550_v5 = vadd.f32 %v1549_v53, %v1461_v42  ;;  %1939 = vmatmul.bf16.gmra.mxu0 %v4200_v58  ;;  %v3207_v42 = vld [vmem:[#allocation2 + $0x10] sm:$0xff] }
 0x211   : > { %2480 = vmatpush.bf16.msra.mxu0 %v3207_v42 }
 0x212   : > { %v1624_v38 = vmax.f32 %v1550_v5, 0.0  ;;  %1502 = vmatmul.bf16.gmra.mxu2 %v4096_v7  ;;  %v3215_v5 = vld [vmem:[#allocation2 + $0x50] sm:$0xff] }
 0x213   : > { %1591 = vmatmul.bf16.gmra.mxu3 %v4100_v12  ;;  %v1902_v35 = vpop.f32.mrf.mxu0  ;;  %2569 = vmatpush.bf16.msra.mxu1 %v3215_v5 }
 0x214   : > { %v4536_v60 = vpack.c.bf16 %v1624_v38, %v1622_v57 }
 0x215   : > { %v1463_v15 = vpop.f32.mrf.mxu2 }
 0x216   : > { %v1552_v11 = vpop.f32.mrf.mxu3  ;;  %2018 = vmatmul.bf16.gmra.mxu1 %v4536_v60  ;;  %v1464_v54 = vadd.f32 %v1463_v15, %v4434_v55 }
 0x218   : > { %v1553_v30 = vadd.f32 %v1552_v11, %v1464_v54 }
 0x21a   : > { %v1626_v21 = vmax.f32 %v1553_v30, 0.0 }
 0x21d   : > { %v1465_v13 = vpop.f32.mrf.mxu2  ;;  %v1905_v16 = vpop.f32.mrf.mxu0 }
 0x21e   : > { %v1466_v7 = vadd.f32 %v1465_v13, %v4434_v55  ;;  %v1554_v9 = vpop.f32.mrf.mxu3 }
 0x220   : > { %v1555_v12 = vadd.f32 %v1554_v9, %v1466_v7  ;;  %1944 = vmatmul.bf16.gmra.mxu0 %v4248_v49 }
 0x222   : > { %v1628_v28 = vmax.f32 %v1555_v12, 0.0  ;;  %2077 = vmatmul.bf16.vlgmr.msra.gmra.mxu2 %v4401_v23  ;;  %v4556_v23 = vperm.slane %v4551_v14, 0 }
 0x223   : > { %2166 = vmatmul.bf16.vlgmr.msra.gmra.mxu3 %v4445_v61 }
 0x224   : > { %v4544_v31 = vpack.c.bf16 %v1628_v28, %v1626_v21  ;;  %v1901_v40 = vadd.f32 %v1900_v45, %v4556_v23  ;;  %v1903_v53 = vadd.f32 %v1902_v35, %v4556_v23  ;;  %v1906_v35 = vadd.f32 %v1905_v16, %v4556_v23 }
 0x225   : > { %v1468_v29 = vpop.f32.mrf.mxu2  ;;  %v1907_v33 = vpop.f32.mrf.mxu0 }
 0x226   : > { %v1557_v34 = vpop.f32.mrf.mxu3  ;;  %2023 = vmatmul.bf16.gmra.mxu1 %v4544_v31  ;;  %v1469_v50 = vadd.f32 %v1468_v29, %v4434_v55 }
 0x228   : > { %v1558_v61 = vadd.f32 %v1557_v34, %v1469_v50 }
 0x22a   : > { %v1630_v63 = vmax.f32 %v1558_v61, 0.0 }
 0x22d   : > { %v1470_v51 = vpop.f32.mrf.mxu2  ;;  %v4553_v56 = vpop.f32.mrf.mxu0 }
 0x22e   : > { %v1471_v37 = vadd.f32 %v1470_v51, %v4434_v55  ;;  %v1559_v27 = vpop.f32.mrf.mxu3  ;;  %v1908_v51 = vadd.f32 %v1907_v33, %v4556_v23  ;;  %v1911_v33 = vadd.f32 %v4553_v56, %v4556_v23 }
 0x230   : > { %v1560_v39 = vadd.f32 %v1559_v27, %v1471_v37  ;;  %1949 = vmatmul.bf16.gmra.mxu0 %v4284_v4 }
 0x232   : > { %v1632_v18 = vmax.f32 %v1560_v39, 0.0  ;;  %2082 = vmatmul.bf16.gmra.mxu2 %v4413_v6 }
 0x233   : > { %2171 = vmatmul.bf16.gmra.mxu3 %v4457_v0  ;;  %v1989_v59 = vpop.f32.mrf.mxu1 }
 0x234   : > { %v1990_v47 = vadd.f32 %v1989_v59, %v1901_v40  ;;  %v4563_v62 = vpack.c.bf16 %v1632_v18, %v1630_v63 }
 0x235   : > { %v1473_v36 = vpop.f32.mrf.mxu2  ;;  %v1912_v46 = vpop.f32.mrf.mxu0 }
 0x236   : > { %v1562_v52 = vpop.f32.mrf.mxu3  ;;  %2028 = vmatmul.bf16.gmra.mxu1 %v4563_v62  ;;  %v1474_v45 = vadd.f32 %v1473_v36, %v4434_v55  ;;  %v2247_v15 = vmax.f32 %v1990_v47, 0.0 }
 0x238   : > { %v1563_v11 = vadd.f32 %v1562_v52, %v1474_v45 }
 0x23a   : > { %v1634_v7 = vmax.f32 %v1563_v11, 0.0  ;;  %v3214_v11 = vld [vmem:[#allocation2 + $0x48] sm:$0xff] }
 0x23b   : > { %v1991_v57 = vpop.f32.mrf.mxu1  ;;  %2570 = vmatpush.bf16.msra.mxu1 %v3214_v11 }
 0x23c   : > { %v1992_v6 = vadd.f32 %v1991_v57, %v1903_v53 }
 0x23d   : > { %v1475_v0 = vpop.f32.mrf.mxu2  ;;  %v4568_v38 = vpop.f32.mrf.mxu0 }
 0x23e   : > { %v2249_v24 = vmax.f32 %v1992_v6, 0.0  ;;  %v1476_v54 = vadd.f32 %v1475_v0, %v4434_v55  ;;  %v1564_v48 = vpop.f32.mrf.mxu3  ;;  %v3206_v0 = vld [vmem:[#allocation2 + $0x8] sm:$0xff] }
 0x23f   : > { %2481 = vmatpush.bf16.msra.mxu0 %v3206_v0 }
 0x240   : > { %v4571_v13 = vpack.c.bf16 %v2249_v24, %v2247_v15  ;;  %v1565_v30 = vadd.f32 %v1564_v48, %v1476_v54  ;;  %1954 = vmatmul.bf16.gmra.mxu0 %v4332_v20  ;;  %v1913_v15 = vadd.f32 %v1912_v46, %v4556_v23  ;;  %v1916_v46 = vadd.f32 %v4568_v38, %v4556_v23 }
 0x242   : > { %v1636_v9 = vmax.f32 %v1565_v30, 0.0  ;;  %2087 = vmatmul.bf16.gmra.mxu2 %v4439_v22 }
 0x243   : > { %2176 = vmatmul.bf16.gmra.mxu3 %v4481_v3  ;;  %v1994_v12 = vpop.f32.mrf.mxu1 }
 0x244   : > { %v1995_v21 = vadd.f32 %v1994_v12, %v1906_v35  ;;  %v4577_v28 = vpack.c.bf16 %v1636_v9, %v1634_v7 }
 0x245   : > { %v1478_v29 = vpop.f32.mrf.mxu2  ;;  %v1917_v34 = vpop.f32.mrf.mxu0 }
 0x246   : > { %v1567_v50 = vpop.f32.mrf.mxu3  ;;  %2033 = vmatmul.bf16.gmra.mxu1 %v4577_v28  ;;  %v1479_v61 = vadd.f32 %v1478_v29, %v4434_v55  ;;  %v2251_v22 = vmax.f32 %v1995_v21, 0.0 }
 0x248   : > { %v1568_v3 = vadd.f32 %v1567_v50, %v1479_v61 }
 0x24a   : > { %v1638_v36 = vmax.f32 %v1568_v3, 0.0  ;;  %v1918_v3 = vadd.f32 %v1917_v34, %v4556_v23 }
 0x24b   : > { %v1996_v16 = vpop.f32.mrf.mxu1 }
 0x24c   : > { %v1997_v37 = vadd.f32 %v1996_v16, %v1908_v51 }
 0x24d   : > { %v1480_v27 = vpop.f32.mrf.mxu2  ;;  %v4582_v39 = vpop.f32.mrf.mxu0 }
 0x24e   : > { %v2253_v40 = vmax.f32 %v1997_v37, 0.0  ;;  %v1481_v63 = vadd.f32 %v1480_v27, %v4434_v55  ;;  %v1569_v18 = vpop.f32.mrf.mxu3  ;;  %v1921_v34 = vadd.f32 %v4582_v39, %v4556_v23  ;;  %v3213_v39 = vld [vmem:[#allocation2 + $0x40] sm:$0xff] }
 0x24f   : > { %2571 = vmatpush.bf16.msra.mxu1 %v3213_v39 }
 0x250   : > { %v1570_v59 = vadd.f32 %v1569_v18, %v1481_v63  ;;  %1959 = vmatmul.bf16.gmra.mxu0 %v4366_v26  ;;  %v4586_v47 = vpack.c.bf16 %v2253_v40, %v2251_v22  ;;  %v3205_v18 = vld [vmem:[#allocation2] sm:$0xff] }
 0x251   : > { %2482 = vmatpush.bf16.msra.mxu0 %v3205_v18 }
 0x252   : > { %v1640_v52 = vmax.f32 %v1570_v59, 0.0  ;;  %2092 = vmatmul.bf16.gmra.mxu2 %v4451_v2 }
 0x253   : > { %2181 = vmatmul.bf16.gmra.mxu3 %v4502_v41  ;;  %v1999_v42 = vpop.f32.mrf.mxu1 }
 0x254   : > { %v2000_v53 = vadd.f32 %v1999_v42, %v1911_v33  ;;  %v4592_v45 = vpack.c.bf16 %v1640_v52, %v1638_v36 }
 0x255   : > { %v1483_v5 = vpop.f32.mrf.mxu2  ;;  %v1922_v57 = vpop.f32.mrf.mxu0 }
 0x256   : > { %v1572_v6 = vpop.f32.mrf.mxu3  ;;  %2038 = vmatmul.bf16.gmra.mxu1 %v4592_v45  ;;  %v1484_v56 = vadd.f32 %v1483_v5, %v4434_v55  ;;  %v2255_v48 = vmax.f32 %v2000_v53, 0.0 }
 0x258   : > { %v1573_v30 = vadd.f32 %v1572_v6, %v1484_v56 }
 0x25a   : > { %v1642_v29 = vmax.f32 %v1573_v30, 0.0 }
 0x25b   : > { %v2001_v24 = vpop.f32.mrf.mxu1 }
 0x25c   : > { %v2002_v2 = vadd.f32 %v2001_v24, %v1913_v15 }
 0x25d   : > { %v1485_v41 = vpop.f32.mrf.mxu2  ;;  %v4597_v54 = vpop.f32.mrf.mxu0 }
 0x25e   : > { %v2257_v35 = vmax.f32 %v2002_v2, 0.0  ;;  %v1486_v7 = vadd.f32 %v1485_v41, %v4434_v55  ;;  %v1574_v9 = vpop.f32.mrf.mxu3 }
 0x260   : > { %v1575_v12 = vadd.f32 %v1574_v9, %v1486_v7  ;;  %1964 = vmatmul.bf16.gmra.mxu0 %v4388_v44  ;;  %v4601_v21 = vpack.c.bf16 %v2257_v35, %v2255_v48  ;;  %v1923_v48 = vadd.f32 %v1922_v57, %v4556_v23  ;;  %v1926_v57 = vadd.f32 %v4597_v54, %v4556_v23 }
 0x262   : > { %v1644_v50 = vmax.f32 %v1575_v12, 0.0  ;;  %2097 = vmatmul.bf16.gmra.mxu2 %v4475_v1 }
 0x263   : > { %2186 = vmatmul.bf16.gmra.mxu3 %v4517_v19  ;;  %v2004_v51 = vpop.f32.mrf.mxu1 }
 0x264   : > { %v2005_v61 = vadd.f32 %v2004_v51, %v1916_v46  ;;  %v4607_v16 = vpack.c.bf16 %v1644_v50, %v1642_v29 }
 0x265   : > { %v1488_v37 = vpop.f32.mrf.mxu2  ;;  %v1927_v27 = vpop.f32.mrf.mxu0 }
 0x266   : > { %v1577_v22 = vpop.f32.mrf.mxu3  ;;  %2043 = vmatmul.bf16.gmra.mxu1 %v4607_v16  ;;  %v1489_v40 = vadd.f32 %v1488_v37, %v4434_v55  ;;  %v2259_v19 = vmax.f32 %v2005_v61, 0.0 }
 0x268   : > { %v1578_v33 = vadd.f32 %v1577_v22, %v1489_v40 }
 0x26a   : > { %v1646_v6 = vmax.f32 %v1578_v33, 0.0 }
 0x26b   : > { %v2006_v38 = vpop.f32.mrf.mxu1 }
 0x26c   : > { %v2007_v63 = vadd.f32 %v2006_v38, %v1918_v3 }
 0x26d   : > { %v1490_v59 = vpop.f32.mrf.mxu2  ;;  %v4612_v1 = vpop.f32.mrf.mxu0 }
 0x26e   : > { %v2261_v36 = vmax.f32 %v2007_v63, 0.0  ;;  %v1491_v52 = vadd.f32 %v1490_v59, %v4434_v55  ;;  %v1579_v42 = vpop.f32.mrf.mxu3 }
 0x270   : > { %v1580_v53 = vadd.f32 %v1579_v42, %v1491_v52  ;;  %1969 = vmatmul.bf16.gmra.mxu0 %v4408_v43  ;;  %v4616_v5 = vpack.c.bf16 %v2261_v36, %v2259_v19  ;;  %v1928_v19 = vadd.f32 %v1927_v27, %v4556_v23  ;;  %v1931_v27 = vadd.f32 %v4612_v1, %v4556_v23 }
 0x272   : > { %v1648_v0 = vmax.f32 %v1580_v53, 0.0  ;;  %2102 = vmatmul.bf16.gmra.mxu2 %v4487_v32 }
 0x273   : > { %2191 = vmatmul.bf16.gmra.mxu3 %v4528_v25  ;;  %v2009_v15 = vpop.f32.mrf.mxu1 }
 0x274   : > { %v2010_v56 = vadd.f32 %v2009_v15, %v1921_v34  ;;  %v4622_v11 = vpack.c.bf16 %v1648_v0, %v1646_v6 }
 0x275   : > { %v1493_v24 = vpop.f32.mrf.mxu2  ;;  %v1932_v2 = vpop.f32.mrf.mxu0 }
 0x276   : > { %v1582_v41 = vpop.f32.mrf.mxu3  ;;  %2048 = vmatmul.bf16.gmra.mxu1 %v4622_v11  ;;  %v1494_v30 = vadd.f32 %v1493_v24, %v4434_v55  ;;  %v2263_v25 = vmax.f32 %v2010_v56, 0.0 }
 0x278   : > { %v1583_v12 = vadd.f32 %v1582_v41, %v1494_v30 }
 0x27a   : > { %v1650_v37 = vmax.f32 %v1583_v12, 0.0 }
 0x27b   : > { %v2011_v35 = vpop.f32.mrf.mxu1 }
 0x27c   : > { %v2012_v7 = vadd.f32 %v2011_v35, %v1923_v48 }
 0x27d   : > { %v1495_v32 = vpop.f32.mrf.mxu2  ;;  %v1935_v9 = vpop.f32.mrf.mxu0 }
 0x27e   : > { %v2265_v46 = vmax.f32 %v2012_v7, 0.0  ;;  %v1496_v29 = vadd.f32 %v1495_v32, %v4434_v55  ;;  %v1584_v50 = vpop.f32.mrf.mxu3 }
 0x280   : > { %v1585_v51 = vadd.f32 %v1584_v50, %v1496_v29  ;;  %1974 = vmatmul.bf16.gmra.mxu0 %v4425_v8  ;;  %v4629_v61 = vpack.c.bf16 %v2265_v46, %v2263_v25 }
 0x282   : > { %v1652_v22 = vmax.f32 %v1585_v51, 0.0  ;;  %2107 = vmatmul.bf16.gmra.mxu2 %v4511_v10 }
 0x283   : > { %2196 = vmatmul.bf16.gmra.mxu3 %v4536_v60  ;;  %v2014_v3 = vpop.f32.mrf.mxu1 }
 0x284   : > { %v2015_v40 = vadd.f32 %v2014_v3, %v1926_v57  ;;  %v4635_v38 = vpack.c.bf16 %v1652_v22, %v1650_v37  ;;  %v1936_v22 = vadd.f32 %v1935_v9, %v4556_v23 }
 0x285   : > { %v1498_v63 = vpop.f32.mrf.mxu2  ;;  %v1937_v18 = vpop.f32.mrf.mxu0 }
 0x286   : > { %v1587_v59 = vpop.f32.mrf.mxu3  ;;  %2053 = vmatmul.bf16.gmra.mxu1 %v4635_v38  ;;  %v1499_v33 = vadd.f32 %v1498_v63, %v4434_v55  ;;  %v2267_v10 = vmax.f32 %v2015_v40, 0.0  ;;  %v1938_v9 = vadd.f32 %v1937_v18, %v4556_v23 }
 0x288   : > { %v1588_v53 = vadd.f32 %v1587_v59, %v1499_v33  ;;  %v4663_v33 = vperm.slane %v4551_v14, 1 }
 0x28a   : > { %v1654_v56 = vmax.f32 %v1588_v53, 0.0 }
 0x28b   : > { %v2016_v54 = vpop.f32.mrf.mxu1 }
 0x28c   : > { %v2017_v36 = vadd.f32 %v2016_v54, %v1928_v19 }
 0x28d   : > { %v1500_v52 = vpop.f32.mrf.mxu2  ;;  %v1940_v42 = vpop.f32.mrf.mxu0 }
 0x28e   : > { %v2269_v60 = vmax.f32 %v2017_v36, 0.0  ;;  %v1501_v34 = vadd.f32 %v1500_v52, %v4434_v55  ;;  %v1589_v6 = vpop.f32.mrf.mxu3 }
 0x290   : > { %v1590_v0 = vadd.f32 %v1589_v6, %v1501_v34  ;;  %2483 = vmatmul.bf16.vlgmr.msra.gmra.mxu0 %v4571_v13  ;;  %v4642_v15 = vpack.c.bf16 %v2269_v60, %v2267_v10  ;;  %v1933_v13 = vadd.f32 %v1932_v2, %v4556_v23 }
 0x292   : > { %v1656_v24 = vmax.f32 %v1590_v0, 0.0  ;;  %2112 = vmatmul.bf16.gmra.mxu2 %v4523_v17 }
 0x293   : > { %2201 = vmatmul.bf16.gmra.mxu3 %v4544_v31  ;;  %v2019_v41 = vpop.f32.mrf.mxu1 }
 0x294   : > { %v2020_v48 = vadd.f32 %v2019_v41, %v1931_v27  ;;  %v4648_v30 = vpack.c.bf16 %v1656_v24, %v1654_v56  ;;  %v1941_v27 = vadd.f32 %v1940_v42, %v4556_v23 }
 0x295   : > { %v1503_v39 = vpop.f32.mrf.mxu2  ;;  %v1942_v35 = vpop.f32.mrf.mxu0 }
 0x296   : > { %v1592_v7 = vpop.f32.mrf.mxu3  ;;  %2058 = vmatmul.bf16.gmra.mxu1 %v4648_v30  ;;  %v1504_v32 = vadd.f32 %v1503_v39, %v4434_v55  ;;  %v2271_v17 = vmax.f32 %v2020_v48, 0.0 }
 0x298   : > { %v1593_v29 = vadd.f32 %v1592_v7, %v1504_v32  ;;  %v1943_v32 = vadd.f32 %v1942_v35, %v4556_v23 }
 0x29a   : > { %v1658_v2 = vmax.f32 %v1593_v29, 0.0 }
 0x29b   : > { %v2021_v1 = vpop.f32.mrf.mxu1 }
 0x29c   : > { %v2022_v25 = vadd.f32 %v2021_v1, %v1933_v13 }
 0x29d   : > { %v1505_v12 = vpop.f32.mrf.mxu2  ;;  %v1945_v46 = vpop.f32.mrf.mxu0 }
 0x29e   : > { %v2273_v31 = vmax.f32 %v2022_v25, 0.0  ;;  %v1506_v50 = vadd.f32 %v1505_v12, %v4434_v55  ;;  %v1594_v51 = vpop.f32.mrf.mxu3 }
 0x2a0   : > { %v1595_v57 = vadd.f32 %v1594_v51, %v1506_v50  ;;  %2488 = vmatmul.bf16.gmra.mxu0 %v4586_v47  ;;  %v4655_v37 = vpack.c.bf16 %v2273_v31, %v2271_v17 }
 0x2a2   : > { %v1660_v3 = vmax.f32 %v1595_v57, 0.0  ;;  %2117 = vmatmul.bf16.gmra.mxu2 %v4200_v58  ;;  %v1946_v57 = vadd.f32 %v1945_v46, %v4556_v23 }
 0x2a3   : > { %2206 = vmatmul.bf16.gmra.mxu3 %v4563_v62  ;;  %v2024_v40 = vpop.f32.mrf.mxu1 }
 0x2a4   : > { %v2025_v63 = vadd.f32 %v2024_v40, %v1936_v22  ;;  %v4660_v59 = vpack.c.bf16 %v1660_v3, %v1658_v2 }
 0x2a5   : > { %v1947_v19 = vpop.f32.mrf.mxu0  ;;  %v2078_v55 = vpop.f32.mrf.mxu2 }
 0x2a6   : > { %v2167_v47 = vpop.f32.mrf.mxu3  ;;  %2063 = vmatmul.bf16.gmra.mxu1 %v4660_v59  ;;  %v2079_v54 = vadd.f32 %v2078_v55, %v4663_v33  ;;  %v2275_v10 = vmax.f32 %v2025_v63, 0.0 }
 0x2a8   : > { %v2168_v53 = vadd.f32 %v2167_v47, %v2079_v54 }
 0x2aa   : > { %v2248_v18 = vmax.f32 %v2168_v53, 0.0 }
 0x2ab   : > { %v2026_v36 = vpop.f32.mrf.mxu1 }
 0x2ac   : > { %v2027_v58 = vadd.f32 %v2026_v36, %v1938_v9  ;;  %v1948_v9 = vadd.f32 %v1947_v19, %v4556_v23 }
 0x2ad   : > { %v1950_v52 = vpop.f32.mrf.mxu0  ;;  %v2080_v62 = vpop.f32.mrf.mxu2 }
 0x2ae   : > { %v2277_v60 = vmax.f32 %v2027_v58, 0.0  ;;  %v2081_v34 = vadd.f32 %v2080_v62, %v4663_v33  ;;  %v2169_v6 = vpop.f32.mrf.mxu3 }
 0x2b0   : > { %v2170_v0 = vadd.f32 %v2169_v6, %v2081_v34  ;;  %2493 = vmatmul.bf16.gmra.mxu0 %v4601_v21  ;;  %v4670_v14 = vpack.c.bf16 %v2277_v60, %v2275_v10  ;;  %v1951_v6 = vadd.f32 %v1950_v52, %v4556_v23 }
 0x2b2   : > { %v2250_v56 = vmax.f32 %v2170_v0, 0.0  ;;  %2122 = vmatmul.bf16.gmra.mxu2 %v4248_v49 }
 0x2b3   : > { %2211 = vmatmul.bf16.gmra.mxu3 %v4577_v28  ;;  %v2029_v24 = vpop.f32.mrf.mxu1 }
 0x2b4   : > { %v2312_v41 = vpack.c.bf16 %v2250_v56, %v2248_v18  ;;  %v2030_v48 = vadd.f32 %v2029_v24, %v1941_v27 }
 0x2b5   : > { %v1952_v39 = vpop.f32.mrf.mxu0  ;;  %v2083_v7 = vpop.f32.mrf.mxu2 }
 0x2b6   : > { %v2172_v13 = vpop.f32.mrf.mxu3  ;;  %2572 = vmatmul.bf16.vlgmr.msra.gmra.mxu1 %v2312_v41  ;;  %v2084_v21 = vadd.f32 %v2083_v7, %v4663_v33  ;;  %v2279_v17 = vmax.f32 %v2030_v48, 0.0  ;;  %v1953_v7 = vadd.f32 %v1952_v39, %v4556_v23 }
 0x2b8   : > { %v2173_v29 = vadd.f32 %v2172_v13, %v2084_v21 }
 0x2ba   : > { %v2252_v35 = vmax.f32 %v2173_v29, 0.0 }
 0x2bb   : > { %v2031_v1 = vpop.f32.mrf.mxu1 }
 0x2bc   : > { %v2032_v25 = vadd.f32 %v2031_v1, %v1943_v32 }
 0x2bd   : > { %v1955_v42 = vpop.f32.mrf.mxu0  ;;  %v2085_v12 = vpop.f32.mrf.mxu2 }
 0x2be   : > { %v2281_v49 = vmax.f32 %v2032_v25, 0.0  ;;  %v2086_v28 = vadd.f32 %v2085_v12, %v4663_v33  ;;  %v2174_v31 = vpop.f32.mrf.mxu3 }
 0x2c0   : > { %v2175_v50 = vadd.f32 %v2174_v31, %v2086_v28  ;;  %2498 = vmatmul.bf16.gmra.mxu0 %v4616_v5  ;;  %v4679_v51 = vpack.c.bf16 %v2281_v49, %v2279_v17  ;;  %v1956_v49 = vadd.f32 %v1955_v42, %v4556_v23 }
 0x2c2   : > { %v2254_v22 = vmax.f32 %v2175_v50, 0.0  ;;  %2127 = vmatmul.bf16.gmra.mxu2 %v4284_v4 }
 0x2c3   : > { %2216 = vmatmul.bf16.gmra.mxu3 %v4592_v45  ;;  %v2034_v2 = vpop.f32.mrf.mxu1 }
 0x2c4   : > { %v2035_v3 = vadd.f32 %v2034_v2, %v1946_v57  ;;  %v2314_v40 = vpack.c.bf16 %v2254_v22, %v2252_v35 }
 0x2c5   : > { %v1957_v63 = vpop.f32.mrf.mxu0  ;;  %v2088_v55 = vpop.f32.mrf.mxu2 }
 0x2c6   : > { %v2177_v47 = vpop.f32.mrf.mxu3  ;;  %2577 = vmatmul.bf16.gmra.mxu1 %v2314_v40  ;;  %v2089_v5 = vadd.f32 %v2088_v55, %v4663_v33  ;;  %v2283_v62 = vmax.f32 %v2035_v3, 0.0  ;;  %v1958_v3 = vadd.f32 %v1957_v63, %v4556_v23 }
 0x2c8   : > { %v2178_v10 = vadd.f32 %v2177_v47, %v2089_v5 }
 0x2ca   : > { %v2256_v19 = vmax.f32 %v2178_v10, 0.0 }
 0x2cb   : > { %v2036_v54 = vpop.f32.mrf.mxu1 }
 0x2cc   : > { %v2037_v36 = vadd.f32 %v2036_v54, %v1948_v9 }
 0x2cd   : > { %v1960_v46 = vpop.f32.mrf.mxu0  ;;  %v2090_v58 = vpop.f32.mrf.mxu2 }
 0x2ce   : > { %v2285_v4 = vmax.f32 %v2037_v36, 0.0  ;;  %v2091_v45 = vadd.f32 %v2090_v58, %v4663_v33  ;;  %v2179_v53 = vpop.f32.mrf.mxu3 }
 0x2d0   : > { %v2180_v60 = vadd.f32 %v2179_v53, %v2091_v45  ;;  %2503 = vmatmul.bf16.gmra.mxu0 %v4629_v61  ;;  %v4688_v34 = vpack.c.bf16 %v2285_v4, %v2283_v62  ;;  %v1961_v62 = vadd.f32 %v1960_v46, %v4556_v23 }
 0x2d2   : > { %v2258_v0 = vmax.f32 %v2180_v60, 0.0  ;;  %2132 = vmatmul.bf16.gmra.mxu2 %v4332_v20 }
 0x2d3   : > { %2221 = vmatmul.bf16.gmra.mxu3 %v4607_v16  ;;  %v2039_v27 = vpop.f32.mrf.mxu1 }
 0x2d4   : > { %v2040_v18 = vadd.f32 %v2039_v27, %v1951_v6  ;;  %v2316_v56 = vpack.c.bf16 %v2258_v0, %v2256_v19 }
 0x2d5   : > { %v1962_v24 = vpop.f32.mrf.mxu0  ;;  %v2093_v41 = vpop.f32.mrf.mxu2 }
 0x2d6   : > { %v2182_v48 = vpop.f32.mrf.mxu3  ;;  %2582 = vmatmul.bf16.gmra.mxu1 %v2316_v56  ;;  %v2094_v61 = vadd.f32 %v2093_v41, %v4663_v33  ;;  %v2287_v1 = vmax.f32 %v2040_v18, 0.0  ;;  %v1963_v0 = vadd.f32 %v1962_v24, %v4556_v23 }
 0x2d8   : > { %v2183_v25 = vadd.f32 %v2182_v48, %v2094_v61 }
 0x2da   : > { %v2260_v39 = vmax.f32 %v2183_v25, 0.0 }
 0x2db   : > { %v2041_v13 = vpop.f32.mrf.mxu1 }
 0x2dc   : > { %v2042_v32 = vadd.f32 %v2041_v13, %v1953_v7 }
 0x2dd   : > { %v1965_v52 = vpop.f32.mrf.mxu0  ;;  %v2095_v21 = vpop.f32.mrf.mxu2 }
 0x2de   : > { %v2289_v20 = vmax.f32 %v2042_v32, 0.0  ;;  %v2096_v16 = vadd.f32 %v2095_v21, %v4663_v33  ;;  %v2184_v12 = vpop.f32.mrf.mxu3  ;;  %v1966_v32 = vadd.f32 %v1965_v52, %v4556_v23 }
 0x2e0   : > { %v2185_v17 = vadd.f32 %v2184_v12, %v2096_v16  ;;  %2508 = vmatmul.bf16.gmra.mxu0 %v4642_v15  ;;  %v4697_v29 = vpack.c.bf16 %v2289_v20, %v2287_v1 }
 0x2e2   : > { %v2262_v28 = vmax.f32 %v2185_v17, 0.0  ;;  %2137 = vmatmul.bf16.gmra.mxu2 %v4366_v26 }
 0x2e3   : > { %2226 = vmatmul.bf16.gmra.mxu3 %v4622_v11  ;;  %v2044_v31 = vpop.f32.mrf.mxu1 }
 0x2e4   : > { %v2045_v50 = vadd.f32 %v2044_v31, %v1956_v49  ;;  %v2318_v57 = vpack.c.bf16 %v2262_v28, %v2260_v39 }
 0x2e5   : > { %v1967_v35 = vpop.f32.mrf.mxu0  ;;  %v2098_v22 = vpop.f32.mrf.mxu2 }
 0x2e6   : > { %v2187_v2 = vpop.f32.mrf.mxu3  ;;  %2587 = vmatmul.bf16.gmra.mxu1 %v2318_v57  ;;  %v2099_v15 = vadd.f32 %v2098_v22, %v4663_v33  ;;  %v2291_v9 = vmax.f32 %v2045_v50, 0.0  ;;  %v1968_v49 = vadd.f32 %v1967_v35, %v4556_v23 }
 0x2e8   : > { %v2188_v5 = vadd.f32 %v2187_v2, %v2099_v15 }
 0x2ea   : > { %v2264_v63 = vmax.f32 %v2188_v5, 0.0 }
 0x2eb   : > { %v2046_v40 = vpop.f32.mrf.mxu1 }
 0x2ec   : > { %v2047_v55 = vadd.f32 %v2046_v40, %v1958_v3 }
 0x2ed   : > { %v1970_v42 = vpop.f32.mrf.mxu0  ;;  %v2100_v47 = vpop.f32.mrf.mxu2 }
 0x2ee   : > { %v2293_v26 = vmax.f32 %v2047_v55, 0.0  ;;  %v2101_v11 = vadd.f32 %v2100_v47, %v4663_v33  ;;  %v2189_v54 = vpop.f32.mrf.mxu3  ;;  %v1971_v15 = vadd.f32 %v1970_v42, %v4556_v23 }
 0x2f0   : > { %v2190_v36 = vadd.f32 %v2189_v54, %v2101_v11  ;;  %2513 = vmatmul.bf16.gmra.mxu0 %v4655_v37  ;;  %v4706_v58 = vpack.c.bf16 %v2293_v26, %v2291_v9 }
 0x2f2   : > { %v2266_v10 = vmax.f32 %v2190_v36, 0.0  ;;  %2142 = vmatmul.bf16.gmra.mxu2 %v4388_v44 }
 0x2f3   : > { %2231 = vmatmul.bf16.gmra.mxu3 %v4635_v38  ;;  %v2049_v4 = vpop.f32.mrf.mxu1 }
 0x2f4   : > { %v2320_v45 = vpack.c.bf16 %v2266_v10, %v2264_v63  ;;  %v2050_v53 = vadd.f32 %v2049_v4, %v1961_v62 }
 0x2f5   : > { %v1972_v60 = vpop.f32.mrf.mxu0  ;;  %v2103_v6 = vpop.f32.mrf.mxu2 }
 0x2f6   : > { %v2192_v19 = vpop.f32.mrf.mxu3  ;;  %2592 = vmatmul.bf16.gmra.mxu1 %v2320_v45  ;;  %v2104_v37 = vadd.f32 %v2103_v6, %v4663_v33  ;;  %v2295_v41 = vmax.f32 %v2050_v53, 0.0  ;;  %v1973_v54 = vadd.f32 %v1972_v60, %v4556_v23 }
 0x2f8   : > { %v2193_v48 = vadd.f32 %v2192_v19, %v2104_v37 }
 0x2fa   : > { %v2268_v24 = vmax.f32 %v2193_v48, 0.0 }
 0x2fb   : > { %v2051_v27 = vpop.f32.mrf.mxu1 }
 0x2fc   : > { %v2052_v18 = vadd.f32 %v2051_v27, %v1963_v0 }
 0x2fd   : > { %v1975_v46 = vpop.f32.mrf.mxu0  ;;  %v2105_v56 = vpop.f32.mrf.mxu2 }
 0x2fe   : > { %v2297_v44 = vmax.f32 %v2052_v18, 0.0  ;;  %v2106_v38 = vadd.f32 %v2105_v56, %v4663_v33  ;;  %v2194_v7 = vpop.f32.mrf.mxu3  ;;  %v1976_v19 = vadd.f32 %v1975_v46, %v4556_v23  ;;  %v4743_v46 = vld [vmem:[%s4880_s8] ss:$0 sm:$0xff] }
 0x300   : > { %v2195_v61 = vadd.f32 %v2194_v7, %v2106_v38  ;;  %2518 = vmatmul.bf16.gmra.mxu0 %v4670_v14  ;;  %v4715_v13 = vpack.c.bf16 %v2297_v44, %v2295_v41 }
 0x302   : > { %v2270_v21 = vmax.f32 %v2195_v61, 0.0  ;;  %2147 = vmatmul.bf16.gmra.mxu2 %v4408_v43 }
 0x303   : > { %2236 = vmatmul.bf16.gmra.mxu3 %v4648_v30  ;;  %v2054_v1 = vpop.f32.mrf.mxu1 }
 0x304   : > { %v2322_v25 = vpack.c.bf16 %v2270_v21, %v2268_v24  ;;  %v2055_v20 = vadd.f32 %v2054_v1, %v1966_v32 }
 0x305   : > { %v1977_v16 = vpop.f32.mrf.mxu0  ;;  %v2108_v12 = vpop.f32.mrf.mxu2 }
 0x306   : > { %v2197_v17 = vpop.f32.mrf.mxu3  ;;  %2597 = vmatmul.bf16.gmra.mxu1 %v2322_v25  ;;  %v2109_v14 = vadd.f32 %v2108_v12, %v4663_v33  ;;  %v2299_v50 = vmax.f32 %v2055_v20, 0.0  ;;  %v1978_v44 = vadd.f32 %v1977_v16, %v4556_v23 }
 0x308   : > { %v2198_v57 = vadd.f32 %v2197_v17, %v2109_v14 }
 0x30a   : > { %v2272_v35 = vmax.f32 %v2198_v57, 0.0 }
 0x30b   : > { %v2056_v39 = vpop.f32.mrf.mxu1 }
 0x30c   : > { %v2057_v28 = vadd.f32 %v2056_v39, %v1968_v49 }
 0x30d   : > { %v2110_v52 = vpop.f32.mrf.mxu2  ;;  %v2484_v31 = vpop.f32.mrf.mxu0 }
 0x30e   : > { %v2301_v43 = vmax.f32 %v2057_v28, 0.0  ;;  %v2111_v30 = vadd.f32 %v2110_v52, %v4663_v33  ;;  %v2199_v22 = vpop.f32.mrf.mxu3  ;;  %v2485_v12 = vadd.f32 %v4743_v46, %v2484_v31 }
 0x310   : > { %v2200_v2 = vadd.f32 %v2199_v22, %v2111_v30  ;;  %2523 = vmatmul.bf16.gmra.mxu0 %v4679_v51  ;;  %v4724_v3 = vpack.c.bf16 %v2301_v43, %v2299_v50 }
 0x312   : > { %v2274_v40 = vmax.f32 %v2200_v2, 0.0  ;;  %2152 = vmatmul.bf16.gmra.mxu2 %v4425_v8 }
 0x313   : > { %2241 = vmatmul.bf16.gmra.mxu3 %v4660_v59  ;;  %v2059_v55 = vpop.f32.mrf.mxu1 }
 0x314   : > { %v2324_v47 = vpack.c.bf16 %v2274_v40, %v2272_v35  ;;  %v2060_v9 = vadd.f32 %v2059_v55, %v1971_v15 }
 0x315   : > { %v2113_v5 = vpop.f32.mrf.mxu2  ;;  %v2486_v26 = vpop.f32.mrf.mxu0 }
 0x316   : > { %v2202_v11 = vpop.f32.mrf.mxu3  ;;  %2602 = vmatmul.bf16.gmra.mxu1 %v2324_v47  ;;  %v2114_v51 = vadd.f32 %v2113_v5, %v4663_v33  ;;  %v2303_v10 = vmax.f32 %v2060_v9, 0.0 }
 0x318   : > { %v2203_v4 = vadd.f32 %v2202_v11, %v2114_v51 }
 0x31a   : > { %v2276_v60 = vmax.f32 %v2203_v4, 0.0 }
 0x31b   : > { %v2061_v36 = vpop.f32.mrf.mxu1 }
 0x31c   : > { %v2062_v62 = vadd.f32 %v2061_v36, %v1973_v54 }
 0x31d   : > { %v2115_v42 = vpop.f32.mrf.mxu2  ;;  %v2489_v63 = vpop.f32.mrf.mxu0 }
 0x31e   : > { %v2305_v8 = vmax.f32 %v2062_v62, 0.0  ;;  %v2116_v59 = vadd.f32 %v2115_v42, %v4663_v33  ;;  %v2204_v45 = vpop.f32.mrf.mxu3  ;;  %v2490_v5 = vadd.f32 %v4743_v46, %v2489_v63 }
 0x320   : > { %v2205_v53 = vadd.f32 %v2204_v45, %v2116_v59  ;;  %2528 = vmatmul.bf16.gmra.mxu0 %v4688_v34  ;;  %v4733_v6 = vpack.c.bf16 %v2305_v8, %v2303_v10 }
 0x322   : > { %v2278_v0 = vmax.f32 %v2205_v53, 0.0 }
 0x323   : > { %v2064_v37 = vpop.f32.mrf.mxu1 }
 0x324   : > { %v2326_v27 = vpack.c.bf16 %v2278_v0, %v2276_v60  ;;  %v2065_v18 = vadd.f32 %v2064_v37, %v1976_v19 }
 0x325   : > { %v2118_v56 = vpop.f32.mrf.mxu2  ;;  %v2491_v41 = vpop.f32.mrf.mxu0 }
 0x326   : > { %v2207_v48 = vpop.f32.mrf.mxu3  ;;  %2607 = vmatmul.bf16.gmra.mxu1 %v2326_v27  ;;  %v2119_v38 = vadd.f32 %v2118_v56, %v4663_v33  ;;  %v2307_v24 = vmax.f32 %v2065_v18, 0.0  ;;  %v2492_v8 = vadd.f32 %v4743_v46, %v2491_v41 }
 0x328   : > { %v2208_v21 = vadd.f32 %v2207_v48, %v2119_v38 }
 0x32a   : > { %v2280_v17 = vmax.f32 %v2208_v21, 0.0 }
 0x32b   : > { %v2066_v7 = vpop.f32.mrf.mxu1 }
 0x32c   : > { %v2067_v34 = vadd.f32 %v2066_v7, %v1978_v44 }
 0x32d   : > { %v2120_v61 = vpop.f32.mrf.mxu2  ;;  %v4738_v32 = vpop.f32.mrf.mxu0 }
 0x32e   : > { %v2309_v1 = vmax.f32 %v2067_v34, 0.0  ;;  %v2121_v25 = vadd.f32 %v2120_v61, %v4663_v33  ;;  %v2209_v20 = vpop.f32.mrf.mxu3  ;;  %v2495_v18 = vadd.f32 %v4743_v46, %v4738_v32 }
 0x330   : > { %v2210_v23 = vadd.f32 %v2209_v20, %v2121_v25  ;;  %2533 = vmatmul.bf16.gmra.mxu0 %v4697_v29  ;;  %v4748_v16 = vpack.c.bf16 %v2309_v1, %v2307_v24  ;;  %v2487_v29 = vadd.f32 %v4743_v46, %v2486_v26 }
 0x332   : > { %v2282_v49 = vmax.f32 %v2210_v23, 0.0 }
 0x333   : > { %v2573_v14 = vpop.f32.mrf.mxu1 }
 0x334   : > { %v2328_v39 = vpack.c.bf16 %v2282_v49, %v2280_v17  ;;  %v2574_v28 = vadd.f32 %v2573_v14, %v2485_v12 }
 0x335   : > { %v2123_v52 = vpop.f32.mrf.mxu2  ;;  %v2496_v50 = vpop.f32.mrf.mxu0 }
 0x336   : > { %v2653_v57 = vmax.f32 %v2574_v28, 0.0  ;;  %v2212_v43 = vpop.f32.mrf.mxu3  ;;  %2612 = vmatmul.bf16.gmra.mxu1 %v2328_v39  ;;  %v2124_v31 = vadd.f32 %v2123_v52, %v4663_v33  ;;  %v2497_v21 = vadd.f32 %v4743_v46, %v2496_v50 }
 0x338   : > { %2685 = vst [vmem:[%s4753_s23] sm:$0xff] %v2653_v57  ;;  %v2213_v35 = vadd.f32 %v2212_v43, %v2124_v31 }
 0x33a   : > { %v2284_v11 = vmax.f32 %v2213_v35, 0.0 }
 0x33b   : > { %v2575_v30 = vpop.f32.mrf.mxu1 }
 0x33c   : > { %v2576_v22 = vadd.f32 %v2575_v30, %v2487_v29 }
 0x33d   : > { %v2125_v2 = vpop.f32.mrf.mxu2  ;;  %v2499_v15 = vpop.f32.mrf.mxu0 }
 0x33e   : > { %v2654_v40 = vmax.f32 %v2576_v22, 0.0  ;;  %v2126_v55 = vadd.f32 %v2125_v2, %v4663_v33  ;;  %v2214_v47 = vpop.f32.mrf.mxu3  ;;  %v2500_v39 = vadd.f32 %v4743_v46, %v2499_v15 }
 0x340   : > { %2686 = vst [vmem:[%s4753_s23 + $0x8] sm:$0xff] %v2654_v40  ;;  %v2215_v9 = vadd.f32 %v2214_v47, %v2126_v55  ;;  %2538 = vmatmul.bf16.gmra.mxu0 %v4706_v58 }
 0x342   : > { %v2286_v26 = vmax.f32 %v2215_v9, 0.0 }
 0x343   : > { %v2578_v54 = vpop.f32.mrf.mxu1 }
 0x344   : > { %v2330_v51 = vpack.c.bf16 %v2286_v26, %v2284_v11  ;;  %v2579_v36 = vadd.f32 %v2578_v54, %v2490_v5 }
 0x345   : > { %v2128_v62 = vpop.f32.mrf.mxu2  ;;  %v2501_v42 = vpop.f32.mrf.mxu0 }
 0x346   : > { %v2655_v10 = vmax.f32 %v2579_v36, 0.0  ;;  %v2217_v4 = vpop.f32.mrf.mxu3  ;;  %2617 = vmatmul.bf16.gmra.mxu1 %v2330_v51  ;;  %v2129_v59 = vadd.f32 %v2128_v62, %v4663_v33  ;;  %v2502_v2 = vadd.f32 %v4743_v46, %v2501_v42 }
 0x348   : > { %2687 = vst [vmem:[%s4753_s23 + $0x10] sm:$0xff] %v2655_v10  ;;  %v2218_v19 = vadd.f32 %v2217_v4, %v2129_v59 }
 0x34a   : > { %v2288_v56 = vmax.f32 %v2218_v19, 0.0 }
 0x34b   : > { %v2580_v45 = vpop.f32.mrf.mxu1 }
 0x34c   : > { %v2581_v58 = vadd.f32 %v2580_v45, %v2492_v8 }
 0x34d   : > { %v2130_v53 = vpop.f32.mrf.mxu2  ;;  %v2504_v63 = vpop.f32.mrf.mxu0 }
 0x34e   : > { %v2656_v60 = vmax.f32 %v2581_v58, 0.0  ;;  %v2131_v0 = vadd.f32 %v2130_v53, %v4663_v33  ;;  %v2219_v37 = vpop.f32.mrf.mxu3  ;;  %v2505_v54 = vadd.f32 %v4743_v46, %v2504_v63 }
 0x350   : > { %2688 = vst [vmem:[%s4753_s23 + $0x18] sm:$0xff] %v2656_v60  ;;  %v2220_v27 = vadd.f32 %v2219_v37, %v2131_v0  ;;  %2543 = vmatmul.bf16.gmra.mxu0 %v4715_v13 }
 0x352   : > { %v2290_v41 = vmax.f32 %v2220_v27, 0.0 }
 0x353   : > { %v2583_v48 = vpop.f32.mrf.mxu1 }
 0x354   : > { %v2332_v44 = vpack.c.bf16 %v2290_v41, %v2288_v56  ;;  %v2584_v38 = vadd.f32 %v2583_v48, %v2495_v18 }
 0x355   : > { %v2133_v7 = vpop.f32.mrf.mxu2  ;;  %v2506_v34 = vpop.f32.mrf.mxu0 }
 0x356   : > { %v2657_v61 = vmax.f32 %v2584_v38, 0.0  ;;  %v2222_v24 = vpop.f32.mrf.mxu3  ;;  %2622 = vmatmul.bf16.gmra.mxu1 %v2332_v44  ;;  %v2134_v1 = vadd.f32 %v2133_v7, %v4663_v33  ;;  %v2507_v58 = vadd.f32 %v4743_v46, %v2506_v34 }
 0x358   : > { %2689 = vst [vmem:[%s4753_s23 + $0x20] sm:$0xff] %v2657_v61  ;;  %v2223_v23 = vadd.f32 %v2222_v24, %v2134_v1 }
 0x35a   : > { %v2292_v28 = vmax.f32 %v2223_v23, 0.0 }
 0x35b   : > { %v2585_v13 = vpop.f32.mrf.mxu1 }
 0x35c   : > { %v2586_v25 = vadd.f32 %v2585_v13, %v2497_v21 }
 0x35d   : > { %v2135_v20 = vpop.f32.mrf.mxu2  ;;  %v2509_v32 = vpop.f32.mrf.mxu0 }
 0x35e   : > { %v2658_v12 = vmax.f32 %v2586_v25, 0.0  ;;  %v2136_v17 = vadd.f32 %v2135_v20, %v4663_v33  ;;  %v2224_v49 = vpop.f32.mrf.mxu3  ;;  %v2510_v41 = vadd.f32 %v4743_v46, %v2509_v32 }
 0x360   : > { %2690 = vst [vmem:[%s4753_s23 + $0x28] sm:$0xff] %v2658_v12  ;;  %v2225_v14 = vadd.f32 %v2224_v49, %v2136_v17  ;;  %2548 = vmatmul.bf16.gmra.mxu0 %v4724_v3 }
 0x362   : > { %v2294_v52 = vmax.f32 %v2225_v14, 0.0 }
 0x363   : > { %v2588_v50 = vpop.f32.mrf.mxu1 }
 0x364   : > { %v2334_v57 = vpack.c.bf16 %v2294_v52, %v2292_v28  ;;  %v2589_v43 = vadd.f32 %v2588_v50, %v2500_v39 }
 0x365   : > { %v2138_v29 = vpop.f32.mrf.mxu2  ;;  %v2511_v31 = vpop.f32.mrf.mxu0 }
 0x366   : > { %v2659_v30 = vmax.f32 %v2589_v43, 0.0  ;;  %v2227_v22 = vpop.f32.mrf.mxu3  ;;  %2627 = vmatmul.bf16.gmra.mxu1 %v2334_v57  ;;  %v2139_v35 = vadd.f32 %v2138_v29, %v4663_v33  ;;  %v2512_v13 = vadd.f32 %v4743_v46, %v2511_v31 }
 0x368   : > { %2691 = vst [vmem:[%s4753_s23 + $0x30] sm:$0xff] %v2659_v30  ;;  %v2228_v47 = vadd.f32 %v2227_v22, %v2139_v35 }
 0x36a   : > { %v2296_v51 = vmax.f32 %v2228_v47, 0.0 }
 0x36b   : > { %v2590_v40 = vpop.f32.mrf.mxu1 }
 0x36c   : > { %v2591_v3 = vadd.f32 %v2590_v40, %v2502_v2 }
 0x36d   : > { %v2140_v55 = vpop.f32.mrf.mxu2  ;;  %v2514_v15 = vpop.f32.mrf.mxu0 }
 0x36e   : > { %v2660_v9 = vmax.f32 %v2591_v3, 0.0  ;;  %v2141_v5 = vadd.f32 %v2140_v55, %v4663_v33  ;;  %v2229_v11 = vpop.f32.mrf.mxu3  ;;  %v2515_v28 = vadd.f32 %v4743_v46, %v2514_v15 }
 0x370   : > { %2692 = vst [vmem:[%s4753_s23 + $0x38] sm:$0xff] %v2660_v9  ;;  %v2230_v26 = vadd.f32 %v2229_v11, %v2141_v5  ;;  %2553 = vmatmul.bf16.gmra.mxu0 %v4733_v6 }
 0x372   : > { %v2298_v36 = vmax.f32 %v2230_v26, 0.0 }
 0x373   : > { %v2593_v62 = vpop.f32.mrf.mxu1 }
 0x374   : > { %v2336_v42 = vpack.c.bf16 %v2298_v36, %v2296_v51  ;;  %v2594_v10 = vadd.f32 %v2593_v62, %v2505_v54 }
 0x375   : > { %v2143_v4 = vpop.f32.mrf.mxu2  ;;  %v2516_v8 = vpop.f32.mrf.mxu0 }
 0x376   : > { %v2661_v59 = vmax.f32 %v2594_v10, 0.0  ;;  %v2232_v45 = vpop.f32.mrf.mxu3  ;;  %2632 = vmatmul.bf16.gmra.mxu1 %v2336_v42  ;;  %v2144_v53 = vadd.f32 %v2143_v4, %v4663_v33  ;;  %v2517_v2 = vadd.f32 %v4743_v46, %v2516_v8 }
 0x378   : > { %2693 = vst [vmem:[%s4753_s23 + $0x40] sm:$0xff] %v2661_v59  ;;  %v2233_v0 = vadd.f32 %v2232_v45, %v2144_v53 }
 0x37a   : > { %v2300_v48 = vmax.f32 %v2233_v0, 0.0 }
 0x37b   : > { %v2595_v19 = vpop.f32.mrf.mxu1 }
 0x37c   : > { %v2596_v6 = vadd.f32 %v2595_v19, %v2507_v58 }
 0x37d   : > { %v2145_v60 = vpop.f32.mrf.mxu2  ;;  %v2519_v63 = vpop.f32.mrf.mxu0 }
 0x37e   : > { %v2662_v37 = vmax.f32 %v2596_v6, 0.0  ;;  %v2146_v27 = vadd.f32 %v2145_v60, %v4663_v33  ;;  %v2234_v18 = vpop.f32.mrf.mxu3  ;;  %v2520_v54 = vadd.f32 %v4743_v46, %v2519_v63 }
 0x380   : > { %2694 = vst [vmem:[%s4753_s23 + $0x48] sm:$0xff] %v2662_v37  ;;  %v2235_v56 = vadd.f32 %v2234_v18, %v2146_v27  ;;  %2558 = vmatmul.bf16.gmra.mxu0 %v4748_v16 }
 0x382   : > { %v2302_v44 = vmax.f32 %v2235_v56, 0.0 }
 0x383   : > { %v2598_v38 = vpop.f32.mrf.mxu1 }
 0x384   : > { %v2338_v7 = vpack.c.bf16 %v2302_v44, %v2300_v48  ;;  %v2599_v34 = vadd.f32 %v2598_v38, %v2510_v41 }
 0x385   : > { %v2148_v61 = vpop.f32.mrf.mxu2  ;;  %v2521_v1 = vpop.f32.mrf.mxu0 }
 0x386   : > { %v2663_v24 = vmax.f32 %v2599_v34, 0.0  ;;  %v2237_v21 = vpop.f32.mrf.mxu3  ;;  %2637 = vmatmul.bf16.gmra.mxu1 %v2338_v7  ;;  %v2149_v25 = vadd.f32 %v2148_v61, %v4663_v33  ;;  %v2522_v59 = vadd.f32 %v4743_v46, %v2521_v1 }
 0x388   : > { %2695 = vst [vmem:[%s4753_s23 + $0x50] sm:$0xff] %v2663_v24  ;;  %v2238_v32 = vadd.f32 %v2237_v21, %v2149_v25 }
 0x38a   : > { %v2304_v52 = vmax.f32 %v2238_v32, 0.0 }
 0x38b   : > { %v2600_v20 = vpop.f32.mrf.mxu1 }
 0x38c   : > { %v2601_v16 = vadd.f32 %v2600_v20, %v2512_v13 }
 0x38d   : > { %v2150_v23 = vpop.f32.mrf.mxu2  ;;  %v2524_v39 = vpop.f32.mrf.mxu0 }
 0x38e   : > { %v2664_v12 = vmax.f32 %v2601_v16, 0.0  ;;  %v2151_v17 = vadd.f32 %v2150_v23, %v4663_v33  ;;  %v2239_v49 = vpop.f32.mrf.mxu3  ;;  %v2525_v19 = vadd.f32 %v4743_v46, %v2524_v39 }
 0x390   : > { %2696 = vst [vmem:[%s4753_s23 + $0x58] sm:$0xff] %v2664_v12  ;;  %v2240_v14 = vadd.f32 %v2239_v49, %v2151_v17 }
 0x392   : > { %v2306_v50 = vmax.f32 %v2240_v14, 0.0 }
 0x393   : > { %v2603_v57 = vpop.f32.mrf.mxu1 }
 0x394   : > { %v2340_v43 = vpack.c.bf16 %v2306_v50, %v2304_v52  ;;  %v2604_v29 = vadd.f32 %v2603_v57, %v2515_v28 }
 0x395   : > { %v2153_v31 = vpop.f32.mrf.mxu2  ;;  %v2526_v40 = vpop.f32.mrf.mxu0 }
 0x396   : > { %v2665_v30 = vmax.f32 %v2604_v29, 0.0  ;;  %v2242_v22 = vpop.f32.mrf.mxu3  ;;  %2642 = vmatmul.bf16.gmra.mxu1 %v2340_v43  ;;  %v2154_v35 = vadd.f32 %v2153_v31, %v4663_v33  ;;  %v2527_v37 = vadd.f32 %v4743_v46, %v2526_v40 }
 0x398   : > { %2697 = vst [vmem:[%s4753_s23 + $0x60] sm:$0xff] %v2665_v30  ;;  %v2243_v15 = vadd.f32 %v2242_v22, %v2154_v35 }
 0x39a   : > { %v2308_v51 = vmax.f32 %v2243_v15, 0.0 }
 0x39b   : > { %v2605_v3 = vpop.f32.mrf.mxu1 }
 0x39c   : > { %v2606_v55 = vadd.f32 %v2605_v3, %v2517_v2 }
 0x39d   : > { %v2155_v47 = vpop.f32.mrf.mxu2  ;;  %v2529_v4 = vpop.f32.mrf.mxu0 }
 0x39e   : > { %v2666_v9 = vmax.f32 %v2606_v55, 0.0  ;;  %v2156_v5 = vadd.f32 %v2155_v47, %v4663_v33  ;;  %v2244_v11 = vpop.f32.mrf.mxu3  ;;  %v2530_v41 = vadd.f32 %v4743_v46, %v2529_v4 }
 0x3a0   : > { %2698 = vst [vmem:[%s4753_s23 + $0x68] sm:$0xff] %v2666_v9  ;;  %v2245_v26 = vadd.f32 %v2244_v11, %v2156_v5 }
 0x3a2   : > { %v2310_v36 = vmax.f32 %v2245_v26, 0.0 }
 0x3a3   : > { %v2608_v62 = vpop.f32.mrf.mxu1 }
 0x3a4   : > { %v2342_v42 = vpack.c.bf16 %v2310_v36, %v2308_v51  ;;  %v2609_v10 = vadd.f32 %v2608_v62, %v2520_v54 }
 0x3a5   : > { %v2531_v53 = vpop.f32.mrf.mxu0 }
 0x3a6   : > { %v2667_v8 = vmax.f32 %v2609_v10, 0.0  ;;  %2647 = vmatmul.bf16.gmra.mxu1 %v2342_v42  ;;  %v2532_v34 = vadd.f32 %v4743_v46, %v2531_v53 }
 0x3a8   : > { %2699 = vst [vmem:[%s4753_s23 + $0x70] sm:$0xff] %v2667_v8 }
 0x3ab   : > { %v2610_v33 = vpop.f32.mrf.mxu1 }
 0x3ac   : > { %v2611_v45 = vadd.f32 %v2610_v33, %v2522_v59 }
 0x3ad   : > { %v2534_v0 = vpop.f32.mrf.mxu0 }
 0x3ae   : > { %v2668_v58 = vmax.f32 %v2611_v45, 0.0  ;;  %v2535_v13 = vadd.f32 %v4743_v46, %v2534_v0 }
 0x3b0   : > { %2700 = vst [vmem:[%s4753_s23 + $0x78] sm:$0xff] %v2668_v58 }
 0x3b3   : > { %v2613_v6 = vpop.f32.mrf.mxu1 }
 0x3b4   : > { %v2614_v60 = vadd.f32 %v2613_v6, %v2525_v19 }
 0x3b5   : > { %v2536_v48 = vpop.f32.mrf.mxu0 }
 0x3b6   : > { %v2669_v63 = vmax.f32 %v2614_v60, 0.0  ;;  %v2537_v32 = vadd.f32 %v4743_v46, %v2536_v48 }
 0x3b8   : > { %2701 = vst [vmem:[%s4753_s23 + $0x80] sm:$0xff] %v2669_v63 }
 0x3bb   : > { %v2615_v27 = vpop.f32.mrf.mxu1 }
 0x3bc   : > { %v2616_v18 = vadd.f32 %v2615_v27, %v2527_v37 }
 0x3bd   : > { %v2539_v21 = vpop.f32.mrf.mxu0 }
 0x3be   : > { %v2670_v56 = vmax.f32 %v2616_v18, 0.0  ;;  %v2540_v39 = vadd.f32 %v4743_v46, %v2539_v21 }
 0x3c0   : > { %2702 = vst [vmem:[%s4753_s23 + $0x88] sm:$0xff] %v2670_v56 }
 0x3c3   : > { %v2618_v44 = vpop.f32.mrf.mxu1 }
 0x3c4   : > { %v2619_v38 = vadd.f32 %v2618_v44, %v2530_v41 }
 0x3c5   : > { %v2541_v23 = vpop.f32.mrf.mxu0 }
 0x3c6   : > { %v2671_v7 = vmax.f32 %v2619_v38, 0.0  ;;  %v2542_v57 = vadd.f32 %v4743_v46, %v2541_v23 }
 0x3c8   : > { %2703 = vst [vmem:[%s4753_s23 + $0x90] sm:$0xff] %v2671_v7 }
 0x3cb   : > { %v2620_v61 = vpop.f32.mrf.mxu1 }
 0x3cc   : > { %v2621_v24 = vadd.f32 %v2620_v61, %v2532_v34 }
 0x3cd   : > { %v2544_v14 = vpop.f32.mrf.mxu0 }
 0x3ce   : > { %v2672_v1 = vmax.f32 %v2621_v24, 0.0  ;;  %v2545_v22 = vadd.f32 %v4743_v46, %v2544_v14 }
 0x3d0   : > { %2704 = vst [vmem:[%s4753_s23 + $0x98] sm:$0xff] %v2672_v1 }
 0x3d3   : > { %v2623_v25 = vpop.f32.mrf.mxu1 }
 0x3d4   : > { %v2624_v20 = vadd.f32 %v2623_v25, %v2535_v13 }
 0x3d5   : > { %v2546_v43 = vpop.f32.mrf.mxu0 }
 0x3d6   : > { %v2673_v16 = vmax.f32 %v2624_v20, 0.0  ;;  %v2547_v55 = vadd.f32 %v4743_v46, %v2546_v43 }
 0x3d8   : > { %2705 = vst [vmem:[%s4753_s23 + $0xa0] sm:$0xff] %v2673_v16 }
 0x3db   : > { %v2625_v12 = vpop.f32.mrf.mxu1 }
 0x3dc   : > { %v2626_v17 = vadd.f32 %v2625_v12, %v2537_v32 }
 0x3dd   : > { %v2549_v40 = vpop.f32.mrf.mxu0 }
 0x3de   : > { %v2674_v49 = vmax.f32 %v2626_v17, 0.0  ;;  %v2550_v11 = vadd.f32 %v4743_v46, %v2549_v40 }
 0x3e0   : > { %2706 = vst [vmem:[%s4753_s23 + $0xa8] sm:$0xff] %v2674_v49 }
 0x3e3   : > { %v2628_v28 = vpop.f32.mrf.mxu1 }
 0x3e4   : > { %v2629_v52 = vadd.f32 %v2628_v28, %v2540_v39 }
 0x3e5   : > { %v2551_v5 = vpop.f32.mrf.mxu0 }
 0x3e6   : > { %v2675_v50 = vmax.f32 %v2629_v52, 0.0  ;;  %v2552_v62 = vadd.f32 %v4743_v46, %v2551_v5 }
 0x3e8   : > { %2707 = vst [vmem:[%s4753_s23 + $0xb0] sm:$0xff] %v2675_v50 }
 0x3eb   : > { %v2630_v29 = vpop.f32.mrf.mxu1 }
 0x3ec   : > { %v2631_v31 = vadd.f32 %v2630_v29, %v2542_v57 }
 0x3ed   : > { %v2554_v36 = vpop.f32.mrf.mxu0 }
 0x3ee   : > { %v2676_v30 = vmax.f32 %v2631_v31, 0.0  ;;  %v2555_v8 = vadd.f32 %v4743_v46, %v2554_v36 }
 0x3f0   : > { %2708 = vst [vmem:[%s4753_s23 + $0xb8] sm:$0xff] %v2676_v30 }
 0x3f3   : > { %v2633_v2 = vpop.f32.mrf.mxu1 }
 0x3f4   : > { %v2634_v35 = vadd.f32 %v2633_v2, %v2545_v22 }
 0x3f5   : > { %v2556_v59 = vpop.f32.mrf.mxu0 }
 0x3f6   : > { %v2677_v3 = vmax.f32 %v2634_v35, 0.0  ;;  %v2557_v53 = vadd.f32 %v4743_v46, %v2556_v59 }
 0x3f8   : > { %2709 = vst [vmem:[%s4753_s23 + $0xc0] sm:$0xff] %v2677_v3 }
 0x3fb   : > { %v2635_v47 = vpop.f32.mrf.mxu1 }
 0x3fc   : > { %v2636_v15 = vadd.f32 %v2635_v47, %v2547_v55 }
 0x3fd   : > { %v2559_v60 = vpop.f32.mrf.mxu0 }
 0x3fe   : > { %v2678_v9 = vmax.f32 %v2636_v15, 0.0  ;;  %v2560_v0 = vadd.f32 %v4743_v46, %v2559_v60 }
 0x400   : > { %2710 = vst [vmem:[%s4753_s23 + $0xc8] sm:$0xff] %v2678_v9 }
 0x403   : > { %v2638_v26 = vpop.f32.mrf.mxu1 }
 0x404   : > { %v2639_v54 = vadd.f32 %v2638_v26, %v2550_v11 }
 0x405   : > { %v2561_v56 = vpop.f32.mrf.mxu0 }
 0x406   : > { %v2679_v51 = vmax.f32 %v2639_v54, 0.0  ;;  %v2562_v41 = vadd.f32 %v4743_v46, %v2561_v56 }
 0x408   : > { %2711 = vst [vmem:[%s4753_s23 + $0xd0] sm:$0xff] %v2679_v51 }
 0x40b   : > { %v2640_v42 = vpop.f32.mrf.mxu1 }
 0x40c   : > { %v2641_v10 = vadd.f32 %v2640_v42, %v2552_v62 }
 0x40e   : > { %v2680_v4 = vmax.f32 %v2641_v10, 0.0 }
 0x410   : > { %2712 = vst [vmem:[%s4753_s23 + $0xd8] sm:$0xff] %v2680_v4 }
 0x413   : > { %v2643_v33 = vpop.f32.mrf.mxu1 }
 0x414   : > { %v2644_v45 = vadd.f32 %v2643_v33, %v2555_v8 }
 0x416   : > { %v2681_v58 = vmax.f32 %v2644_v45, 0.0 }
 0x418   : > { %2713 = vst [vmem:[%s4753_s23 + $0xe0] sm:$0xff] %v2681_v58 }
 0x41b   : > { %v2645_v19 = vpop.f32.mrf.mxu1 }
 0x41c   : > { %v2646_v6 = vadd.f32 %v2645_v19, %v2557_v53 }
 0x41e   : > { %v2682_v63 = vmax.f32 %v2646_v6, 0.0 }
 0x420   : > { %2714 = vst [vmem:[%s4753_s23 + $0xe8] sm:$0xff] %v2682_v63 }
 0x423   : > { %v2648_v37 = vpop.f32.mrf.mxu1 }
 0x424   : > { %v2649_v27 = vadd.f32 %v2648_v37, %v2560_v0 }
 0x426   : > { %v2683_v18 = vmax.f32 %v2649_v27, 0.0 }
 0x428   : > { %2715 = vst [vmem:[%s4753_s23 + $0xf0] sm:$0xff] %v2683_v18 }
 0x42b   : > { %v2650_v48 = vpop.f32.mrf.mxu1 }
 0x42c   : > { %v2651_v44 = vadd.f32 %v2650_v48, %v2562_v41 }
 0x42e   : > { %v2684_v38 = vmax.f32 %v2651_v44, 0.0 }
 0x430   : > { %2716 = vst [vmem:[%s4753_s23 + $0xf8] sm:$0xff] %v2684_v38 }
 0x431   : > { %3390 = shalt.err (!%p3387_p8)
}
 0x432   : > { %s3436_s17 = smov 128   ;;  %s3437_s23 = smov 8  }
 0x433   : > { %3242 = dma.vmem_to_hbm [thread:$0]  (%p3526_p5), %s2731_s28, 4096, %s2733_s29, %s2718_s13, %s3436_s17, %s3436_s17, %s3437_s23  }
 0x434 PF: > { %p3254_p9 = scmp.ge.s32.totalorder %s3429_s12, 2  ;;  %s2747_s27 = sand.u32 1, %s3417_s30  }
 0x435   : > { %s2748_s21 = scalar_lea.sflag [#allocation4], %s2747_s27 }
 0x436   : > { %p3249_p10 = pnand %p3254_p9, %p3530_p6 }
 0x438   : > { %p3250_p11 = pneg %p3249_p10 }
 0x43a   : > { %3412 = dma.done.wait (%p3250_p11), %s2748_s21, 4096  }
 0x43b   : > { %3414 = vsyncadd (%p3250_p11), %s2748_s21, 4294963200  ;;  %p20_p12 = scmp.ge.s32.totalorder %s3513_s15, 4   ;;  %s4884_s30 = smov %s3421_s10 }
 0x43c   : > { %s4885_s10 = smov %s3425_s11  ;;  %s4886_s11 = smov %s3524_s18 }
 0x43d   : > { %s4887_s12 = smov %s3513_s15  ;;  %22 = sbr.rel (!%p20_p12) target bundleno = 4 (0x4), region = 96 }
 0x442   :  { %2754 = vsyncpa [#allocation3], 1 }
 0x443   :  { %2756 = vsyncpa [#allocation3 + $0x1], 1 }
 0x444   :  { %2757 = vsyncpa [#allocation4], 1 }
 0x445   :  { %2759 = vsyncpa [#allocation4 + $0x1], 1 }

</bundles_post_ra>
